<compile_context>
chip_gen: v7x
topology: tpu7x:2x2x1
jax: 0.10.0
libtpu: 0.0.40
codegen_flags: <defaults>
</compile_context>

<pallas_src>
import functools

import jax
import jax.numpy as jnp
from jax import lax
from jax.experimental import pallas as pl
from jax.experimental.pallas import tpu as pltpu


def _cbam_kernel(K, H, W, x_ref, w1t_ref, w2t_ref, mask_ref, wsa_ref, o_ref,
                 xca_ref, pada_ref, padm_ref):
    # x_ref   : (TB, C, HW)   VMEM  lane-dense activations
    # w1t_ref : (C, Cr)       VMEM  fc[0].weight transposed
    # w2t_ref : (Cr, C)       VMEM  fc[2].weight transposed
    # mask_ref: (K, HW)       VMEM  0/1 column-validity masks per tap column j
    # wsa_ref : (2*K*K,)      SMEM  spatial conv taps, flat [c, i, j]
    # o_ref   : (TB, C, HW)   VMEM
    # xca_ref : (TB, C, HW)   VMEM scratch: x * channel_attention
    # pada_ref: (TB, PADLEN)  VMEM scratch: zero-haloed flat avg map
    # padm_ref: (TB, PADLEN)  VMEM scratch: zero-haloed flat max map
    TB, C, HW = x_ref.shape
    P = K // 2
    KK = K * K
    START = P * W + P  # interior offset inside the zero-padded flat row

    x = x_ref[...].astype(jnp.float32)                    # (TB, C, HW)

    # ---------------- channel attention (batched over TB) ----------------
    avg_c = jnp.mean(x, axis=2)                           # (TB, C)
    max_c = jnp.max(x, axis=2)                            # (TB, C)
    cat = jnp.concatenate([avg_c, max_c], axis=0)         # (2*TB, C)
    w1t = w1t_ref[...].astype(jnp.float32)                # (C, Cr)
    w2t = w2t_ref[...].astype(jnp.float32)                # (Cr, C)
    h = jnp.maximum(
        jnp.dot(cat, w1t, preferred_element_type=jnp.float32), 0.0)   # (2TB,Cr)
    o2 = jnp.dot(h, w2t, preferred_element_type=jnp.float32)          # (2TB,C)
    ca = jax.nn.sigmoid(o2[:TB] + o2[TB:])                # (TB, C)

    # x * ca, cached in VMEM so the epilogue is a single x_ca * sa pass.
    xca_ref[...] = x * ca[:, :, None]

    # ---------------- spatial attention (batched over TB) ----------------
    xca = xca_ref[...]
    avg_sp = jnp.mean(xca, axis=1)                        # (TB, HW)
    max_sp = jnp.max(xca, axis=1)                         # (TB, HW)

    # Zero-haloed flat scratch; only the interior is rewritten, the zero halo
    # absorbs vertical out-of-range taps (horizontal wrap handled by masks).
    pada_ref[...] = jnp.zeros_like(pada_ref)
    padm_ref[...] = jnp.zeros_like(padm_ref)
    pada_ref[:, pl.ds(START, HW)] = avg_sp
    padm_ref[:, pl.ds(START, HW)] = max_sp

    # KxK cross-correlation over the 2-channel (avg, max) map, done in the
    # flattened domain: shifted (TB, HW) reads + column masks.  Issued once
    # per grid step (sublane-dense when TB >= 8).
    conv = jnp.zeros((TB, HW), jnp.float32)
    for j in range(K):
        cm = mask_ref[pl.ds(j, 1), :]                     # (1, HW)
        acc = jnp.zeros((TB, HW), jnp.float32)
        for i in range(K):
            off = i * W + j
            wa = wsa_ref[i * K + j]                       # avg-channel tap
            wm = wsa_ref[KK + i * K + j]                  # max-channel tap
            acc = acc + wa * pada_ref[:, pl.ds(off, HW)] \
                      + wm * padm_ref[:, pl.ds(off, HW)]
        conv = conv + cm * acc
    sa = jax.nn.sigmoid(conv)                             # (TB, HW)

    # Single lane-dense epilogue store.
    o_ref[...] = (xca_ref[...] * sa[:, None, :]).astype(o_ref.dtype)


def cbam_pallas(x, w1, w2, wsa, kernel_size=7, max_block_bytes=8 << 20):
    B, C, H, W = x.shape
    Cr = w1.shape[0]
    K = kernel_size
    P = K // 2
    HW = H * W
    PADLEN = (H + 2 * P) * W + 2 * P   # max tap offset + HW == PADLEN exactly

    x_flat = x.reshape(B, C, HW)                          # lane-dense layout
    wsa_flat = wsa.reshape(-1)                            # (2*K*K,) [c, i, j]
    w1t = jnp.transpose(w1)                               # (C, Cr)
    w2t = jnp.transpose(w2)                               # (Cr, C)

    # Column-validity masks for the flattened conv (host-side, tiny).
    cols = jnp.arange(HW, dtype=jnp.int32) % W
    col_masks = jnp.stack(
        [((cols >= (P - j)) & (cols < (W + P - j))) for j in range(K)]
    ).astype(jnp.float32)                                 # (K, HW)

    itemsize = jnp.dtype(x.dtype).itemsize
    per_image = C * HW * itemsize
    tb = int(max(1, min(B, max_block_bytes // max(per_image, 1))))
    # v7x has 2 TensorCores: keep >= 2 grid steps so the "parallel" batch axis
    # can actually be sharded.
    tb = int(min(tb, max(1, pl.cdiv(B, 2))))
    # Sublane-dense conv slices when possible.
    if tb >= 8:
        tb -= tb % 8
    grid = (pl.cdiv(B, tb),)

    # VMEM budget: double-buffered input + output (~4x block) + scratch,
    # capped at 48 MiB to leave headroom on v7x (64 MiB per TC).
    block_bytes = tb * per_image
    scratch_bytes = tb * C * HW * 4 + 2 * tb * PADLEN * 4
    vmem_limit = int(min(48 << 20,
                         max(16 << 20,
                             4 * block_bytes + scratch_bytes + (2 << 20))))

    kernel = functools.partial(_cbam_kernel, K, H, W)
    out_flat = pl.pallas_call(
        kernel,
        out_shape=jax.ShapeDtypeStruct((B, C, HW), x.dtype),
        grid=grid,
        in_specs=[
            pl.BlockSpec((tb, C, HW), lambda b: (b, 0, 0)),
            pl.BlockSpec((C, Cr), lambda b: (0, 0)),
            pl.BlockSpec((Cr, C), lambda b: (0, 0)),
            pl.BlockSpec((K, HW), lambda b: (0, 0)),
            pl.BlockSpec(memory_space=pltpu.MemorySpace.SMEM),
        ],
        out_specs=pl.BlockSpec((tb, C, HW), lambda b: (b, 0, 0)),
        scratch_shapes=[
            pltpu.VMEM((tb, C, HW), jnp.float32),
            pltpu.VMEM((tb, PADLEN), jnp.float32),
            pltpu.VMEM((tb, PADLEN), jnp.float32),
        ],
        compiler_params=pltpu.CompilerParams(
            dimension_semantics=("parallel",),
            vmem_limit_bytes=vmem_limit),
    )(x_flat, w1t, w2t, col_masks, wsa_flat)
    return out_flat.reshape(B, C, H, W)


def cbam_ref(x, w1, w2, wsa):
    """Pure-JAX reference mirroring the PyTorch CBAM forward (NCHW)."""
    avg = jnp.mean(x, axis=(2, 3))                        # (B, C)
    mx = jnp.max(x, axis=(2, 3))                          # (B, C)

    def mlp(v):
        return jnp.maximum(v @ w1.T, 0.0) @ w2.T

    ca = jax.nn.sigmoid(mlp(avg) + mlp(mx))[:, :, None, None]
    x_ca = x * ca
    avg_sp = jnp.mean(x_ca, axis=1, keepdims=True)
    max_sp = jnp.max(x_ca, axis=1, keepdims=True)
    cat = jnp.concatenate([avg_sp, max_sp], axis=1)       # (B, 2, H, W)
    K = wsa.shape[-1]
    conv = lax.conv_general_dilated(
        cat, wsa[None],                                   # (1, 2, K, K)
        window_strides=(1, 1),
        padding=[(K // 2, K // 2), (K // 2, K // 2)],
        dimension_numbers=("NCHW", "OIHW", "NCHW"))
    sa = jax.nn.sigmoid(conv)
    return x_ca * sa


if __name__ == "__main__":
    B, C, H, W = 2, 32, 16, 16
    ratio, K = 16, 7
    Cr = C // ratio                                       # = 2

    key = jax.random.PRNGKey(0)
    kx, k1, k2, k3 = jax.random.split(key, 4)
    x = jax.random.normal(kx, (B, C, H, W), dtype=jnp.float32)
    # Deterministic synthetic weights (shapes from the module's __init__),
    # all conv layers are bias-free as in the reference module.
    w1 = jax.random.normal(k1, (Cr, C), dtype=jnp.float32) * 0.2    # fc[0].weight (Cr,C,1,1)
    w2 = jax.random.normal(k2, (C, Cr), dtype=jnp.float32) * 0.2    # fc[2].weight (C,Cr,1,1)
    wsa = jax.random.normal(k3, (2, K, K), dtype=jnp.float32) * 0.1  # conv1.weight (1,2,K,K)

    out = cbam_pallas(x, w1, w2, wsa, kernel_size=K)
    out = jax.block_until_ready(out)

    ref = cbam_ref(x, w1, w2, wsa)
    assert out.shape == ref.shape and out.dtype == ref.dtype
    max_err = float(jnp.max(jnp.abs(out - ref)))
    assert max_err < 1e-4, f"max abs err {max_err}"
    print("KERNEL_OK")
</pallas_src>

<mosaic_0001>
module attributes {stable_mosaic.version = 11 : i64} {
  func.func @_cbam_kernel(%arg0: i32, %arg1: memref<1x32x256xf32, #tpu.memory_space<vmem>>, %arg2: memref<32x2xf32, #tpu.memory_space<vmem>>, %arg3: memref<2x32xf32, #tpu.memory_space<vmem>>, %arg4: memref<7x256xf32, #tpu.memory_space<vmem>>, %arg5: memref<98xf32, #tpu.memory_space<smem>>, %arg6: memref<1x32x256xf32, #tpu.memory_space<vmem>>, %arg7: memref<1x32x256xf32, #tpu.memory_space<vmem>>, %arg8: memref<1x358xf32, #tpu.memory_space<vmem>>, %arg9: memref<1x358xf32, #tpu.memory_space<vmem>>) attributes {dimension_semantics = [#tpu.dimension_semantics<parallel>], iteration_bounds = array<i64: 2>, scalar_prefetch = 0 : i64, scratch_operands = 3 : i64, tpu.core_type = #tpu.core_type<tc>, window_params = [{transform_indices = @transform_0, window_bounds = array<i64: 1, 32, 256>}, {pipeline_mode = #tpu.pipeline_mode<synchronous>, transform_indices = @transform_1, window_bounds = array<i64: 32, 2>}, {pipeline_mode = #tpu.pipeline_mode<synchronous>, transform_indices = @transform_2, window_bounds = array<i64: 2, 32>}, {pipeline_mode = #tpu.pipeline_mode<synchronous>, transform_indices = @transform_3, window_bounds = array<i64: 7, 256>}, {transform_indices = @transform_4, window_bounds = array<i64: 98>}, {transform_indices = @transform_5, window_bounds = array<i64: 1, 32, 256>}]} {
    %c0 = arith.constant 0 : index
    %c0_0 = arith.constant 0 : index
    %c0_1 = arith.constant 0 : index
    %0 = vector.load %arg1[%c0, %c0_0, %c0_1] : memref<1x32x256xf32, #tpu.memory_space<vmem>>, vector<1x32x256xf32>
    %cst = arith.constant dense<0.000000e+00> : vector<1x32xf32>
    %1 = vector.multi_reduction <add>, %0, %cst [2] : vector<1x32x256xf32> to vector<1x32xf32>
    %cst_2 = arith.constant 2.560000e+02 : f32
    %2 = vector.broadcast %cst_2 : f32 to vector<1x32xf32>
    %3 = arith.divf %1, %2 : vector<1x32xf32>
    %cst_3 = arith.constant dense<0xFF800000> : vector<1x32xf32>
    %4 = vector.multi_reduction <maximumf>, %0, %cst_3 [2] : vector<1x32x256xf32> to vector<1x32xf32>
    %5 = tpu.concatenate %3, %4 in 0 : vector<1x32xf32>, vector<1x32xf32> -> vector<2x32xf32>
    %c0_4 = arith.constant 0 : index
    %c0_5 = arith.constant 0 : index
    %6 = vector.load %arg2[%c0_4, %c0_5] : memref<32x2xf32, #tpu.memory_space<vmem>>, vector<32x2xf32>
    %c0_6 = arith.constant 0 : index
    %c0_7 = arith.constant 0 : index
    %7 = vector.load %arg3[%c0_6, %c0_7] : memref<2x32xf32, #tpu.memory_space<vmem>>, vector<2x32xf32>
    %cst_8 = arith.constant dense<0.000000e+00> : vector<2x2xf32>
    %8 = tpu.matmul %5, %6, %cst_8 {dimension_numbers = #tpu.dot_dimension_numbers<[1], [0], [0], [1], [0, 0, 1, 1], [], []>} : vector<2x32xf32>, vector<32x2xf32>, vector<2x2xf32> -> vector<2x2xf32>
    %cst_9 = arith.constant 0.000000e+00 : f32
    %9 = vector.broadcast %cst_9 : f32 to vector<2x2xf32>
    %10 = arith.maximumf %8, %9 : vector<2x2xf32>
    %cst_10 = arith.constant dense<0.000000e+00> : vector<2x32xf32>
    %11 = tpu.matmul %10, %7, %cst_10 {dimension_numbers = #tpu.dot_dimension_numbers<[1], [0], [0], [1], [0, 0, 1, 1], [], []>} : vector<2x2xf32>, vector<2x32xf32>, vector<2x32xf32> -> vector<2x32xf32>
    %12 = vector.extract_strided_slice %11 {offsets = [0, 0], sizes = [1, 32], strides = [1, 1]} : vector<2x32xf32> to vector<1x32xf32>
    %13 = vector.extract_strided_slice %11 {offsets = [1, 0], sizes = [1, 32], strides = [1, 1]} : vector<2x32xf32> to vector<1x32xf32>
    %14 = arith.addf %12, %13 : vector<1x32xf32>
    %15 = arith.negf %14 : vector<1x32xf32>
    %16 = math.exp %15 : vector<1x32xf32>
    %cst_11 = arith.constant 1.000000e+00 : f32
    %17 = vector.broadcast %cst_11 : f32 to vector<1x32xf32>
    %18 = arith.addf %17, %16 : vector<1x32xf32>
    %19 = arith.divf %17, %18 : vector<1x32xf32>
    %20 = vector.shape_cast %19 : vector<1x32xf32> to vector<1x32x1xf32>
    %21 = vector.broadcast %20 : vector<1x32x1xf32> to vector<1x32x256xf32>
    %22 = arith.mulf %0, %21 : vector<1x32x256xf32>
    %c0_12 = arith.constant 0 : index
    %c0_13 = arith.constant 0 : index
    %c0_14 = arith.constant 0 : index
    %23 = vector.load %arg7[%c0_12, %c0_13, %c0_14] : memref<1x32x256xf32, #tpu.memory_space<vmem>>, vector<1x32x256xf32>
    tpu.vector_store %arg7[%c0_12, %c0_13, %c0_14], %22 {strides = array<i32>} : memref<1x32x256xf32, #tpu.memory_space<vmem>>, vector<1x32x256xf32>,
    %c0_15 = arith.constant 0 : index
    %c0_16 = arith.constant 0 : index
    %c0_17 = arith.constant 0 : index
    %24 = vector.load %arg7[%c0_15, %c0_16, %c0_17] : memref<1x32x256xf32, #tpu.memory_space<vmem>>, vector<1x32x256xf32>
    %cst_18 = arith.constant dense<0.000000e+00> : vector<1x256xf32>
    %25 = vector.multi_reduction <add>, %24, %cst_18 [1] : vector<1x32x256xf32> to vector<1x256xf32>
    %cst_19 = arith.constant 3.200000e+01 : f32
    %26 = vector.broadcast %cst_19 : f32 to vector<1x256xf32>
    %27 = arith.divf %25, %26 : vector<1x256xf32>
    %cst_20 = arith.constant dense<0xFF800000> : vector<1x256xf32>
    %28 = vector.multi_reduction <maximumf>, %24, %cst_20 [1] : vector<1x32x256xf32> to vector<1x256xf32>
    %cst_21 = arith.constant 0.000000e+00 : f32
    %29 = vector.broadcast %cst_21 : f32 to vector<1x358xf32>
    %c0_22 = arith.constant 0 : index
    %c0_23 = arith.constant 0 : index
    %30 = vector.load %arg8[%c0_22, %c0_23] : memref<1x358xf32, #tpu.memory_space<vmem>>, vector<1x358xf32>
    tpu.vector_store %arg8[%c0_22, %c0_23], %29 {strides = array<i32>} : memref<1x358xf32, #tpu.memory_space<vmem>>, vector<1x358xf32>,
    %cst_24 = arith.constant 0.000000e+00 : f32
    %31 = vector.broadcast %cst_24 : f32 to vector<1x358xf32>
    %c0_25 = arith.constant 0 : index
    %c0_26 = arith.constant 0 : index
    %32 = vector.load %arg9[%c0_25, %c0_26] : memref<1x358xf32, #tpu.memory_space<vmem>>, vector<1x358xf32>
    tpu.vector_store %arg9[%c0_25, %c0_26], %31 {strides = array<i32>} : memref<1x358xf32, #tpu.memory_space<vmem>>, vector<1x358xf32>,
    %c0_27 = arith.constant 0 : index
    %c51 = arith.constant 51 : index
    %33 = vector.load %arg8[%c0_27, %c51] : memref<1x358xf32, #tpu.memory_space<vmem>>, vector<1x256xf32>
    tpu.vector_store %arg8[%c0_27, %c51], %27 {strides = array<i32>} : memref<1x358xf32, #tpu.memory_space<vmem>>, vector<1x256xf32>,
    %c0_28 = arith.constant 0 : index
    %c51_29 = arith.constant 51 : index
    %34 = vector.load %arg9[%c0_28, %c51_29] : memref<1x358xf32, #tpu.memory_space<vmem>>, vector<1x256xf32>
    tpu.vector_store %arg9[%c0_28, %c51_29], %28 {strides = array<i32>} : memref<1x358xf32, #tpu.memory_space<vmem>>, vector<1x256xf32>,
    %cst_30 = arith.constant 0.000000e+00 : f32
    %35 = vector.broadcast %cst_30 : f32 to vector<1x256xf32>
    %c0_31 = arith.constant 0 : index
    %c0_32 = arith.constant 0 : index
    %36 = vector.load %arg4[%c0_31, %c0_32] : memref<7x256xf32, #tpu.memory_space<vmem>>, vector<1x256xf32>
    %cst_33 = arith.constant 0.000000e+00 : f32
    %37 = vector.broadcast %cst_33 : f32 to vector<1x256xf32>
    %c0_34 = arith.constant 0 : index
    %38 = memref.load %arg5[%c0_34] : memref<98xf32, #tpu.memory_space<smem>>
    %c49 = arith.constant 49 : index
    %39 = memref.load %arg5[%c49] : memref<98xf32, #tpu.memory_space<smem>>
    %c0_35 = arith.constant 0 : index
    %c0_36 = arith.constant 0 : index
    %40 = vector.load %arg8[%c0_35, %c0_36] : memref<1x358xf32, #tpu.memory_space<vmem>>, vector<1x256xf32>
    %41 = vector.broadcast %38 : f32 to vector<1x256xf32>
    %42 = arith.mulf %41, %40 : vector<1x256xf32>
    %43 = arith.addf %37, %42 : vector<1x256xf32>
    %c0_37 = arith.constant 0 : index
    %c0_38 = arith.constant 0 : index
    %44 = vector.load %arg9[%c0_37, %c0_38] : memref<1x358xf32, #tpu.memory_space<vmem>>, vector<1x256xf32>
    %45 = vector.broadcast %39 : f32 to vector<1x256xf32>
    %46 = arith.mulf %45, %44 : vector<1x256xf32>
    %47 = arith.addf %43, %46 : vector<1x256xf32>
    %c7 = arith.constant 7 : index
    %48 = memref.load %arg5[%c7] : memref<98xf32, #tpu.memory_space<smem>>
    %c56 = arith.constant 56 : index
    %49 = memref.load %arg5[%c56] : memref<98xf32, #tpu.memory_space<smem>>
    %c0_39 = arith.constant 0 : index
    %c16 = arith.constant 16 : index
    %50 = vector.load %arg8[%c0_39, %c16] : memref<1x358xf32, #tpu.memory_space<vmem>>, vector<1x256xf32>
    %51 = vector.broadcast %48 : f32 to vector<1x256xf32>
    %52 = arith.mulf %51, %50 : vector<1x256xf32>
    %53 = arith.addf %47, %52 : vector<1x256xf32>
    %c0_40 = arith.constant 0 : index
    %c16_41 = arith.constant 16 : index
    %54 = vector.load %arg9[%c0_40, %c16_41] : memref<1x358xf32, #tpu.memory_space<vmem>>, vector<1x256xf32>
    %55 = vector.broadcast %49 : f32 to vector<1x256xf32>
    %56 = arith.mulf %55, %54 : vector<1x256xf32>
    %57 = arith.addf %53, %56 : vector<1x256xf32>
    %c14 = arith.constant 14 : index
    %58 = memref.load %arg5[%c14] : memref<98xf32, #tpu.memory_space<smem>>
    %c63 = arith.constant 63 : index
    %59 = memref.load %arg5[%c63] : memref<98xf32, #tpu.memory_space<smem>>
    %c0_42 = arith.constant 0 : index
    %c32 = arith.constant 32 : index
    %60 = vector.load %arg8[%c0_42, %c32] : memref<1x358xf32, #tpu.memory_space<vmem>>, vector<1x256xf32>
    %61 = vector.broadcast %58 : f32 to vector<1x256xf32>
    %62 = arith.mulf %61, %60 : vector<1x256xf32>
    %63 = arith.addf %57, %62 : vector<1x256xf32>
    %c0_43 = arith.constant 0 : index
    %c32_44 = arith.constant 32 : index
    %64 = vector.load %arg9[%c0_43, %c32_44] : memref<1x358xf32, #tpu.memory_space<vmem>>, vector<1x256xf32>
    %65 = vector.broadcast %59 : f32 to vector<1x256xf32>
    %66 = arith.mulf %65, %64 : vector<1x256xf32>
    %67 = arith.addf %63, %66 : vector<1x256xf32>
    %c21 = arith.constant 21 : index
    %68 = memref.load %arg5[%c21] : memref<98xf32, #tpu.memory_space<smem>>
    %c70 = arith.constant 70 : index
    %69 = memref.load %arg5[%c70] : memref<98xf32, #tpu.memory_space<smem>>
    %c0_45 = arith.constant 0 : index
    %c48 = arith.constant 48 : index
    %70 = vector.load %arg8[%c0_45, %c48] : memref<1x358xf32, #tpu.memory_space<vmem>>, vector<1x256xf32>
    %71 = vector.broadcast %68 : f32 to vector<1x256xf32>
    %72 = arith.mulf %71, %70 : vector<1x256xf32>
    %73 = arith.addf %67, %72 : vector<1x256xf32>
    %c0_46 = arith.constant 0 : index
    %c48_47 = arith.constant 48 : index
    %74 = vector.load %arg9[%c0_46, %c48_47] : memref<1x358xf32, #tpu.memory_space<vmem>>, vector<1x256xf32>
    %75 = vector.broadcast %69 : f32 to vector<1x256xf32>
    %76 = arith.mulf %75, %74 : vector<1x256xf32>
    %77 = arith.addf %73, %76 : vector<1x256xf32>
    %c28 = arith.constant 28 : index
    %78 = memref.load %arg5[%c28] : memref<98xf32, #tpu.memory_space<smem>>
    %c77 = arith.constant 77 : index
    %79 = memref.load %arg5[%c77] : memref<98xf32, #tpu.memory_space<smem>>
    %c0_48 = arith.constant 0 : index
    %c64 = arith.constant 64 : index
    %80 = vector.load %arg8[%c0_48, %c64] : memref<1x358xf32, #tpu.memory_space<vmem>>, vector<1x256xf32>
    %81 = vector.broadcast %78 : f32 to vector<1x256xf32>
    %82 = arith.mulf %81, %80 : vector<1x256xf32>
    %83 = arith.addf %77, %82 : vector<1x256xf32>
    %c0_49 = arith.constant 0 : index
    %c64_50 = arith.constant 64 : index
    %84 = vector.load %arg9[%c0_49, %c64_50] : memref<1x358xf32, #tpu.memory_space<vmem>>, vector<1x256xf32>
    %85 = vector.broadcast %79 : f32 to vector<1x256xf32>
    %86 = arith.mulf %85, %84 : vector<1x256xf32>
    %87 = arith.addf %83, %86 : vector<1x256xf32>
    %c35 = arith.constant 35 : index
    %88 = memref.load %arg5[%c35] : memref<98xf32, #tpu.memory_space<smem>>
    %c84 = arith.constant 84 : index
    %89 = memref.load %arg5[%c84] : memref<98xf32, #tpu.memory_space<smem>>
    %c0_51 = arith.constant 0 : index
    %c80 = arith.constant 80 : index
    %90 = vector.load %arg8[%c0_51, %c80] : memref<1x358xf32, #tpu.memory_space<vmem>>, vector<1x256xf32>
    %91 = vector.broadcast %88 : f32 to vector<1x256xf32>
    %92 = arith.mulf %91, %90 : vector<1x256xf32>
    %93 = arith.addf %87, %92 : vector<1x256xf32>
    %c0_52 = arith.constant 0 : index
    %c80_53 = arith.constant 80 : index
    %94 = vector.load %arg9[%c0_52, %c80_53] : memref<1x358xf32, #tpu.memory_space<vmem>>, vector<1x256xf32>
    %95 = vector.broadcast %89 : f32 to vector<1x256xf32>
    %96 = arith.mulf %95, %94 : vector<1x256xf32>
    %97 = arith.addf %93, %96 : vector<1x256xf32>
    %c42 = arith.constant 42 : index
    %98 = memref.load %arg5[%c42] : memref<98xf32, #tpu.memory_space<smem>>
    %c91 = arith.constant 91 : index
    %99 = memref.load %arg5[%c91] : memref<98xf32, #tpu.memory_space<smem>>
    %c0_54 = arith.constant 0 : index
    %c96 = arith.constant 96 : index
    %100 = vector.load %arg8[%c0_54, %c96] : memref<1x358xf32, #tpu.memory_space<vmem>>, vector<1x256xf32>
    %101 = vector.broadcast %98 : f32 to vector<1x256xf32>
    %102 = arith.mulf %101, %100 : vector<1x256xf32>
    %103 = arith.addf %97, %102 : vector<1x256xf32>
    %c0_55 = arith.constant 0 : index
    %c96_56 = arith.constant 96 : index
    %104 = vector.load %arg9[%c0_55, %c96_56] : memref<1x358xf32, #tpu.memory_space<vmem>>, vector<1x256xf32>
    %105 = vector.broadcast %99 : f32 to vector<1x256xf32>
    %106 = arith.mulf %105, %104 : vector<1x256xf32>
    %107 = arith.addf %103, %106 : vector<1x256xf32>
    %108 = arith.mulf %36, %107 : vector<1x256xf32>
    %109 = arith.addf %35, %108 : vector<1x256xf32>
    %c1 = arith.constant 1 : index
    %c0_57 = arith.constant 0 : index
    %110 = vector.load %arg4[%c1, %c0_57] : memref<7x256xf32, #tpu.memory_space<vmem>>, vector<1x256xf32>
    %cst_58 = arith.constant 0.000000e+00 : f32
    %111 = vector.broadcast %cst_58 : f32 to vector<1x256xf32>
    %c1_59 = arith.constant 1 : index
    %112 = memref.load %arg5[%c1_59] : memref<98xf32, #tpu.memory_space<smem>>
    %c50 = arith.constant 50 : index
    %113 = memref.load %arg5[%c50] : memref<98xf32, #tpu.memory_space<smem>>
    %c0_60 = arith.constant 0 : index
    %c1_61 = arith.constant 1 : index
    %114 = vector.load %arg8[%c0_60, %c1_61] : memref<1x358xf32, #tpu.memory_space<vmem>>, vector<1x256xf32>
    %115 = vector.broadcast %112 : f32 to vector<1x256xf32>
    %116 = arith.mulf %115, %114 : vector<1x256xf32>
    %117 = arith.addf %111, %116 : vector<1x256xf32>
    %c0_62 = arith.constant 0 : index
    %c1_63 = arith.constant 1 : index
    %118 = vector.load %arg9[%c0_62, %c1_63] : memref<1x358xf32, #tpu.memory_space<vmem>>, vector<1x256xf32>
    %119 = vector.broadcast %113 : f32 to vector<1x256xf32>
    %120 = arith.mulf %119, %118 : vector<1x256xf32>
    %121 = arith.addf %117, %120 : vector<1x256xf32>
    %c8 = arith.constant 8 : index
    %122 = memref.load %arg5[%c8] : memref<98xf32, #tpu.memory_space<smem>>
    %c57 = arith.constant 57 : index
    %123 = memref.load %arg5[%c57] : memref<98xf32, #tpu.memory_space<smem>>
    %c0_64 = arith.constant 0 : index
    %c17 = arith.constant 17 : index
    %124 = vector.load %arg8[%c0_64, %c17] : memref<1x358xf32, #tpu.memory_space<vmem>>, vector<1x256xf32>
    %125 = vector.broadcast %122 : f32 to vector<1x256xf32>
    %126 = arith.mulf %125, %124 : vector<1x256xf32>
    %127 = arith.addf %121, %126 : vector<1x256xf32>
    %c0_65 = arith.constant 0 : index
    %c17_66 = arith.constant 17 : index
    %128 = vector.load %arg9[%c0_65, %c17_66] : memref<1x358xf32, #tpu.memory_space<vmem>>, vector<1x256xf32>
    %129 = vector.broadcast %123 : f32 to vector<1x256xf32>
    %130 = arith.mulf %129, %128 : vector<1x256xf32>
    %131 = arith.addf %127, %130 : vector<1x256xf32>
    %c15 = arith.constant 15 : index
    %132 = memref.load %arg5[%c15] : memref<98xf32, #tpu.memory_space<smem>>
    %c64_67 = arith.constant 64 : index
    %133 = memref.load %arg5[%c64_67] : memref<98xf32, #tpu.memory_space<smem>>
    %c0_68 = arith.constant 0 : index
    %c33 = arith.constant 33 : index
    %134 = vector.load %arg8[%c0_68, %c33] : memref<1x358xf32, #tpu.memory_space<vmem>>, vector<1x256xf32>
    %135 = vector.broadcast %132 : f32 to vector<1x256xf32>
    %136 = arith.mulf %135, %134 : vector<1x256xf32>
    %137 = arith.addf %131, %136 : vector<1x256xf32>
    %c0_69 = arith.constant 0 : index
    %c33_70 = arith.constant 33 : index
    %138 = vector.load %arg9[%c0_69, %c33_70] : memref<1x358xf32, #tpu.memory_space<vmem>>, vector<1x256xf32>
    %139 = vector.broadcast %133 : f32 to vector<1x256xf32>
    %140 = arith.mulf %139, %138 : vector<1x256xf32>
    %141 = arith.addf %137, %140 : vector<1x256xf32>
    %c22 = arith.constant 22 : index
    %142 = memref.load %arg5[%c22] : memref<98xf32, #tpu.memory_space<smem>>
    %c71 = arith.constant 71 : index
    %143 = memref.load %arg5[%c71] : memref<98xf32, #tpu.memory_space<smem>>
    %c0_71 = arith.constant 0 : index
    %c49_72 = arith.constant 49 : index
    %144 = vector.load %arg8[%c0_71, %c49_72] : memref<1x358xf32, #tpu.memory_space<vmem>>, vector<1x256xf32>
    %145 = vector.broadcast %142 : f32 to vector<1x256xf32>
    %146 = arith.mulf %145, %144 : vector<1x256xf32>
    %147 = arith.addf %141, %146 : vector<1x256xf32>
    %c0_73 = arith.constant 0 : index
    %c49_74 = arith.constant 49 : index
    %148 = vector.load %arg9[%c0_73, %c49_74] : memref<1x358xf32, #tpu.memory_space<vmem>>, vector<1x256xf32>
    %149 = vector.broadcast %143 : f32 to vector<1x256xf32>
    %150 = arith.mulf %149, %148 : vector<1x256xf32>
    %151 = arith.addf %147, %150 : vector<1x256xf32>
    %c29 = arith.constant 29 : index
    %152 = memref.load %arg5[%c29] : memref<98xf32, #tpu.memory_space<smem>>
    %c78 = arith.constant 78 : index
    %153 = memref.load %arg5[%c78] : memref<98xf32, #tpu.memory_space<smem>>
    %c0_75 = arith.constant 0 : index
    %c65 = arith.constant 65 : index
    %154 = vector.load %arg8[%c0_75, %c65] : memref<1x358xf32, #tpu.memory_space<vmem>>, vector<1x256xf32>
    %155 = vector.broadcast %152 : f32 to vector<1x256xf32>
    %156 = arith.mulf %155, %154 : vector<1x256xf32>
    %157 = arith.addf %151, %156 : vector<1x256xf32>
    %c0_76 = arith.constant 0 : index
    %c65_77 = arith.constant 65 : index
    %158 = vector.load %arg9[%c0_76, %c65_77] : memref<1x358xf32, #tpu.memory_space<vmem>>, vector<1x256xf32>
    %159 = vector.broadcast %153 : f32 to vector<1x256xf32>
    %160 = arith.mulf %159, %158 : vector<1x256xf32>
    %161 = arith.addf %157, %160 : vector<1x256xf32>
    %c36 = arith.constant 36 : index
    %162 = memref.load %arg5[%c36] : memref<98xf32, #tpu.memory_space<smem>>
    %c85 = arith.constant 85 : index
    %163 = memref.load %arg5[%c85] : memref<98xf32, #tpu.memory_space<smem>>
    %c0_78 = arith.constant 0 : index
    %c81 = arith.constant 81 : index
    %164 = vector.load %arg8[%c0_78, %c81] : memref<1x358xf32, #tpu.memory_space<vmem>>, vector<1x256xf32>
    %165 = vector.broadcast %162 : f32 to vector<1x256xf32>
    %166 = arith.mulf %165, %164 : vector<1x256xf32>
    %167 = arith.addf %161, %166 : vector<1x256xf32>
    %c0_79 = arith.constant 0 : index
    %c81_80 = arith.constant 81 : index
    %168 = vector.load %arg9[%c0_79, %c81_80] : memref<1x358xf32, #tpu.memory_space<vmem>>, vector<1x256xf32>
    %169 = vector.broadcast %163 : f32 to vector<1x256xf32>
    %170 = arith.mulf %169, %168 : vector<1x256xf32>
    %171 = arith.addf %167, %170 : vector<1x256xf32>
    %c43 = arith.constant 43 : index
    %172 = memref.load %arg5[%c43] : memref<98xf32, #tpu.memory_space<smem>>
    %c92 = arith.constant 92 : index
    %173 = memref.load %arg5[%c92] : memref<98xf32, #tpu.memory_space<smem>>
    %c0_81 = arith.constant 0 : index
    %c97 = arith.constant 97 : index
    %174 = vector.load %arg8[%c0_81, %c97] : memref<1x358xf32, #tpu.memory_space<vmem>>, vector<1x256xf32>
    %175 = vector.broadcast %172 : f32 to vector<1x256xf32>
    %176 = arith.mulf %175, %174 : vector<1x256xf32>
    %177 = arith.addf %171, %176 : vector<1x256xf32>
    %c0_82 = arith.constant 0 : index
    %c97_83 = arith.constant 97 : index
    %178 = vector.load %arg9[%c0_82, %c97_83] : memref<1x358xf32, #tpu.memory_space<vmem>>, vector<1x256xf32>
    %179 = vector.broadcast %173 : f32 to vector<1x256xf32>
    %180 = arith.mulf %179, %178 : vector<1x256xf32>
    %181 = arith.addf %177, %180 : vector<1x256xf32>
    %182 = arith.mulf %110, %181 : vector<1x256xf32>
    %183 = arith.addf %109, %182 : vector<1x256xf32>
    %c2 = arith.constant 2 : index
    %c0_84 = arith.constant 0 : index
    %184 = vector.load %arg4[%c2, %c0_84] : memref<7x256xf32, #tpu.memory_space<vmem>>, vector<1x256xf32>
    %cst_85 = arith.constant 0.000000e+00 : f32
    %185 = vector.broadcast %cst_85 : f32 to vector<1x256xf32>
    %c2_86 = arith.constant 2 : index
    %186 = memref.load %arg5[%c2_86] : memref<98xf32, #tpu.memory_space<smem>>
    %c51_87 = arith.constant 51 : index
    %187 = memref.load %arg5[%c51_87] : memref<98xf32, #tpu.memory_space<smem>>
    %c0_88 = arith.constant 0 : index
    %c2_89 = arith.constant 2 : index
    %188 = vector.load %arg8[%c0_88, %c2_89] : memref<1x358xf32, #tpu.memory_space<vmem>>, vector<1x256xf32>
    %189 = vector.broadcast %186 : f32 to vector<1x256xf32>
    %190 = arith.mulf %189, %188 : vector<1x256xf32>
    %191 = arith.addf %185, %190 : vector<1x256xf32>
    %c0_90 = arith.constant 0 : index
    %c2_91 = arith.constant 2 : index
    %192 = vector.load %arg9[%c0_90, %c2_91] : memref<1x358xf32, #tpu.memory_space<vmem>>, vector<1x256xf32>
    %193 = vector.broadcast %187 : f32 to vector<1x256xf32>
    %194 = arith.mulf %193, %192 : vector<1x256xf32>
    %195 = arith.addf %191, %194 : vector<1x256xf32>
    %c9 = arith.constant 9 : index
    %196 = memref.load %arg5[%c9] : memref<98xf32, #tpu.memory_space<smem>>
    %c58 = arith.constant 58 : index
    %197 = memref.load %arg5[%c58] : memref<98xf32, #tpu.memory_space<smem>>
    %c0_92 = arith.constant 0 : index
    %c18 = arith.constant 18 : index
    %198 = vector.load %arg8[%c0_92, %c18] : memref<1x358xf32, #tpu.memory_space<vmem>>, vector<1x256xf32>
    %199 = vector.broadcast %196 : f32 to vector<1x256xf32>
    %200 = arith.mulf %199, %198 : vector<1x256xf32>
    %201 = arith.addf %195, %200 : vector<1x256xf32>
    %c0_93 = arith.constant 0 : index
    %c18_94 = arith.constant 18 : index
    %202 = vector.load %arg9[%c0_93, %c18_94] : memref<1x358xf32, #tpu.memory_space<vmem>>, vector<1x256xf32>
    %203 = vector.broadcast %197 : f32 to vector<1x256xf32>
    %204 = arith.mulf %203, %202 : vector<1x256xf32>
    %205 = arith.addf %201, %204 : vector<1x256xf32>
    %c16_95 = arith.constant 16 : index
    %206 = memref.load %arg5[%c16_95] : memref<98xf32, #tpu.memory_space<smem>>
    %c65_96 = arith.constant 65 : index
    %207 = memref.load %arg5[%c65_96] : memref<98xf32, #tpu.memory_space<smem>>
    %c0_97 = arith.constant 0 : index
    %c34 = arith.constant 34 : index
    %208 = vector.load %arg8[%c0_97, %c34] : memref<1x358xf32, #tpu.memory_space<vmem>>, vector<1x256xf32>
    %209 = vector.broadcast %206 : f32 to vector<1x256xf32>
    %210 = arith.mulf %209, %208 : vector<1x256xf32>
    %211 = arith.addf %205, %210 : vector<1x256xf32>
    %c0_98 = arith.constant 0 : index
    %c34_99 = arith.constant 34 : index
    %212 = vector.load %arg9[%c0_98, %c34_99] : memref<1x358xf32, #tpu.memory_space<vmem>>, vector<1x256xf32>
    %213 = vector.broadcast %207 : f32 to vector<1x256xf32>
    %214 = arith.mulf %213, %212 : vector<1x256xf32>
    %215 = arith.addf %211, %214 : vector<1x256xf32>
    %c23 = arith.constant 23 : index
    %216 = memref.load %arg5[%c23] : memref<98xf32, #tpu.memory_space<smem>>
    %c72 = arith.constant 72 : index
    %217 = memref.load %arg5[%c72] : memref<98xf32, #tpu.memory_space<smem>>
    %c0_100 = arith.constant 0 : index
    %c50_101 = arith.constant 50 : index
    %218 = vector.load %arg8[%c0_100, %c50_101] : memref<1x358xf32, #tpu.memory_space<vmem>>, vector<1x256xf32>
    %219 = vector.broadcast %216 : f32 to vector<1x256xf32>
    %220 = arith.mulf %219, %218 : vector<1x256xf32>
    %221 = arith.addf %215, %220 : vector<1x256xf32>
    %c0_102 = arith.constant 0 : index
    %c50_103 = arith.constant 50 : index
    %222 = vector.load %arg9[%c0_102, %c50_103] : memref<1x358xf32, #tpu.memory_space<vmem>>, vector<1x256xf32>
    %223 = vector.broadcast %217 : f32 to vector<1x256xf32>
    %224 = arith.mulf %223, %222 : vector<1x256xf32>
    %225 = arith.addf %221, %224 : vector<1x256xf32>
    %c30 = arith.constant 30 : index
    %226 = memref.load %arg5[%c30] : memref<98xf32, #tpu.memory_space<smem>>
    %c79 = arith.constant 79 : index
    %227 = memref.load %arg5[%c79] : memref<98xf32, #tpu.memory_space<smem>>
    %c0_104 = arith.constant 0 : index
    %c66 = arith.constant 66 : index
    %228 = vector.load %arg8[%c0_104, %c66] : memref<1x358xf32, #tpu.memory_space<vmem>>, vector<1x256xf32>
    %229 = vector.broadcast %226 : f32 to vector<1x256xf32>
    %230 = arith.mulf %229, %228 : vector<1x256xf32>
    %231 = arith.addf %225, %230 : vector<1x256xf32>
    %c0_105 = arith.constant 0 : index
    %c66_106 = arith.constant 66 : index
    %232 = vector.load %arg9[%c0_105, %c66_106] : memref<1x358xf32, #tpu.memory_space<vmem>>, vector<1x256xf32>
    %233 = vector.broadcast %227 : f32 to vector<1x256xf32>
    %234 = arith.mulf %233, %232 : vector<1x256xf32>
    %235 = arith.addf %231, %234 : vector<1x256xf32>
    %c37 = arith.constant 37 : index
    %236 = memref.load %arg5[%c37] : memref<98xf32, #tpu.memory_space<smem>>
    %c86 = arith.constant 86 : index
    %237 = memref.load %arg5[%c86] : memref<98xf32, #tpu.memory_space<smem>>
    %c0_107 = arith.constant 0 : index
    %c82 = arith.constant 82 : index
    %238 = vector.load %arg8[%c0_107, %c82] : memref<1x358xf32, #tpu.memory_space<vmem>>, vector<1x256xf32>
    %239 = vector.broadcast %236 : f32 to vector<1x256xf32>
    %240 = arith.mulf %239, %238 : vector<1x256xf32>
    %241 = arith.addf %235, %240 : vector<1x256xf32>
    %c0_108 = arith.constant 0 : index
    %c82_109 = arith.constant 82 : index
    %242 = vector.load %arg9[%c0_108, %c82_109] : memref<1x358xf32, #tpu.memory_space<vmem>>, vector<1x256xf32>
    %243 = vector.broadcast %237 : f32 to vector<1x256xf32>
    %244 = arith.mulf %243, %242 : vector<1x256xf32>
    %245 = arith.addf %241, %244 : vector<1x256xf32>
    %c44 = arith.constant 44 : index
    %246 = memref.load %arg5[%c44] : memref<98xf32, #tpu.memory_space<smem>>
    %c93 = arith.constant 93 : index
    %247 = memref.load %arg5[%c93] : memref<98xf32, #tpu.memory_space<smem>>
    %c0_110 = arith.constant 0 : index
    %c98 = arith.constant 98 : index
    %248 = vector.load %arg8[%c0_110, %c98] : memref<1x358xf32, #tpu.memory_space<vmem>>, vector<1x256xf32>
    %249 = vector.broadcast %246 : f32 to vector<1x256xf32>
    %250 = arith.mulf %249, %248 : vector<1x256xf32>
    %251 = arith.addf %245, %250 : vector<1x256xf32>
    %c0_111 = arith.constant 0 : index
    %c98_112 = arith.constant 98 : index
    %252 = vector.load %arg9[%c0_111, %c98_112] : memref<1x358xf32, #tpu.memory_space<vmem>>, vector<1x256xf32>
    %253 = vector.broadcast %247 : f32 to vector<1x256xf32>
    %254 = arith.mulf %253, %252 : vector<1x256xf32>
    %255 = arith.addf %251, %254 : vector<1x256xf32>
    %256 = arith.mulf %184, %255 : vector<1x256xf32>
    %257 = arith.addf %183, %256 : vector<1x256xf32>
    %c3 = arith.constant 3 : index
    %c0_113 = arith.constant 0 : index
    %258 = vector.load %arg4[%c3, %c0_113] : memref<7x256xf32, #tpu.memory_space<vmem>>, vector<1x256xf32>
    %cst_114 = arith.constant 0.000000e+00 : f32
    %259 = vector.broadcast %cst_114 : f32 to vector<1x256xf32>
    %c3_115 = arith.constant 3 : index
    %260 = memref.load %arg5[%c3_115] : memref<98xf32, #tpu.memory_space<smem>>
    %c52 = arith.constant 52 : index
    %261 = memref.load %arg5[%c52] : memref<98xf32, #tpu.memory_space<smem>>
    %c0_116 = arith.constant 0 : index
    %c3_117 = arith.constant 3 : index
    %262 = vector.load %arg8[%c0_116, %c3_117] : memref<1x358xf32, #tpu.memory_space<vmem>>, vector<1x256xf32>
    %263 = vector.broadcast %260 : f32 to vector<1x256xf32>
    %264 = arith.mulf %263, %262 : vector<1x256xf32>
    %265 = arith.addf %259, %264 : vector<1x256xf32>
    %c0_118 = arith.constant 0 : index
    %c3_119 = arith.constant 3 : index
    %266 = vector.load %arg9[%c0_118, %c3_119] : memref<1x358xf32, #tpu.memory_space<vmem>>, vector<1x256xf32>
    %267 = vector.broadcast %261 : f32 to vector<1x256xf32>
    %268 = arith.mulf %267, %266 : vector<1x256xf32>
    %269 = arith.addf %265, %268 : vector<1x256xf32>
    %c10 = arith.constant 10 : index
    %270 = memref.load %arg5[%c10] : memref<98xf32, #tpu.memory_space<smem>>
    %c59 = arith.constant 59 : index
    %271 = memref.load %arg5[%c59] : memref<98xf32, #tpu.memory_space<smem>>
    %c0_120 = arith.constant 0 : index
    %c19 = arith.constant 19 : index
    %272 = vector.load %arg8[%c0_120, %c19] : memref<1x358xf32, #tpu.memory_space<vmem>>, vector<1x256xf32>
    %273 = vector.broadcast %270 : f32 to vector<1x256xf32>
    %274 = arith.mulf %273, %272 : vector<1x256xf32>
    %275 = arith.addf %269, %274 : vector<1x256xf32>
    %c0_121 = arith.constant 0 : index
    %c19_122 = arith.constant 19 : index
    %276 = vector.load %arg9[%c0_121, %c19_122] : memref<1x358xf32, #tpu.memory_space<vmem>>, vector<1x256xf32>
    %277 = vector.broadcast %271 : f32 to vector<1x256xf32>
    %278 = arith.mulf %277, %276 : vector<1x256xf32>
    %279 = arith.addf %275, %278 : vector<1x256xf32>
    %c17_123 = arith.constant 17 : index
    %280 = memref.load %arg5[%c17_123] : memref<98xf32, #tpu.memory_space<smem>>
    %c66_124 = arith.constant 66 : index
    %281 = memref.load %arg5[%c66_124] : memref<98xf32, #tpu.memory_space<smem>>
    %c0_125 = arith.constant 0 : index
    %c35_126 = arith.constant 35 : index
    %282 = vector.load %arg8[%c0_125, %c35_126] : memref<1x358xf32, #tpu.memory_space<vmem>>, vector<1x256xf32>
    %283 = vector.broadcast %280 : f32 to vector<1x256xf32>
    %284 = arith.mulf %283, %282 : vector<1x256xf32>
    %285 = arith.addf %279, %284 : vector<1x256xf32>
    %c0_127 = arith.constant 0 : index
    %c35_128 = arith.constant 35 : index
    %286 = vector.load %arg9[%c0_127, %c35_128] : memref<1x358xf32, #tpu.memory_space<vmem>>, vector<1x256xf32>
    %287 = vector.broadcast %281 : f32 to vector<1x256xf32>
    %288 = arith.mulf %287, %286 : vector<1x256xf32>
    %289 = arith.addf %285, %288 : vector<1x256xf32>
    %c24 = arith.constant 24 : index
    %290 = memref.load %arg5[%c24] : memref<98xf32, #tpu.memory_space<smem>>
    %c73 = arith.constant 73 : index
    %291 = memref.load %arg5[%c73] : memref<98xf32, #tpu.memory_space<smem>>
    %c0_129 = arith.constant 0 : index
    %c51_130 = arith.constant 51 : index
    %292 = vector.load %arg8[%c0_129, %c51_130] : memref<1x358xf32, #tpu.memory_space<vmem>>, vector<1x256xf32>
    %293 = vector.broadcast %290 : f32 to vector<1x256xf32>
    %294 = arith.mulf %293, %292 : vector<1x256xf32>
    %295 = arith.addf %289, %294 : vector<1x256xf32>
    %c0_131 = arith.constant 0 : index
    %c51_132 = arith.constant 51 : index
    %296 = vector.load %arg9[%c0_131, %c51_132] : memref<1x358xf32, #tpu.memory_space<vmem>>, vector<1x256xf32>
    %297 = vector.broadcast %291 : f32 to vector<1x256xf32>
    %298 = arith.mulf %297, %296 : vector<1x256xf32>
    %299 = arith.addf %295, %298 : vector<1x256xf32>
    %c31 = arith.constant 31 : index
    %300 = memref.load %arg5[%c31] : memref<98xf32, #tpu.memory_space<smem>>
    %c80_133 = arith.constant 80 : index
    %301 = memref.load %arg5[%c80_133] : memref<98xf32, #tpu.memory_space<smem>>
    %c0_134 = arith.constant 0 : index
    %c67 = arith.constant 67 : index
    %302 = vector.load %arg8[%c0_134, %c67] : memref<1x358xf32, #tpu.memory_space<vmem>>, vector<1x256xf32>
    %303 = vector.broadcast %300 : f32 to vector<1x256xf32>
    %304 = arith.mulf %303, %302 : vector<1x256xf32>
    %305 = arith.addf %299, %304 : vector<1x256xf32>
    %c0_135 = arith.constant 0 : index
    %c67_136 = arith.constant 67 : index
    %306 = vector.load %arg9[%c0_135, %c67_136] : memref<1x358xf32, #tpu.memory_space<vmem>>, vector<1x256xf32>
    %307 = vector.broadcast %301 : f32 to vector<1x256xf32>
    %308 = arith.mulf %307, %306 : vector<1x256xf32>
    %309 = arith.addf %305, %308 : vector<1x256xf32>
    %c38 = arith.constant 38 : index
    %310 = memref.load %arg5[%c38] : memref<98xf32, #tpu.memory_space<smem>>
    %c87 = arith.constant 87 : index
    %311 = memref.load %arg5[%c87] : memref<98xf32, #tpu.memory_space<smem>>
    %c0_137 = arith.constant 0 : index
    %c83 = arith.constant 83 : index
    %312 = vector.load %arg8[%c0_137, %c83] : memref<1x358xf32, #tpu.memory_space<vmem>>, vector<1x256xf32>
    %313 = vector.broadcast %310 : f32 to vector<1x256xf32>
    %314 = arith.mulf %313, %312 : vector<1x256xf32>
    %315 = arith.addf %309, %314 : vector<1x256xf32>
    %c0_138 = arith.constant 0 : index
    %c83_139 = arith.constant 83 : index
    %316 = vector.load %arg9[%c0_138, %c83_139] : memref<1x358xf32, #tpu.memory_space<vmem>>, vector<1x256xf32>
    %317 = vector.broadcast %311 : f32 to vector<1x256xf32>
    %318 = arith.mulf %317, %316 : vector<1x256xf32>
    %319 = arith.addf %315, %318 : vector<1x256xf32>
    %c45 = arith.constant 45 : index
    %320 = memref.load %arg5[%c45] : memref<98xf32, #tpu.memory_space<smem>>
    %c94 = arith.constant 94 : index
    %321 = memref.load %arg5[%c94] : memref<98xf32, #tpu.memory_space<smem>>
    %c0_140 = arith.constant 0 : index
    %c99 = arith.constant 99 : index
    %322 = vector.load %arg8[%c0_140, %c99] : memref<1x358xf32, #tpu.memory_space<vmem>>, vector<1x256xf32>
    %323 = vector.broadcast %320 : f32 to vector<1x256xf32>
    %324 = arith.mulf %323, %322 : vector<1x256xf32>
    %325 = arith.addf %319, %324 : vector<1x256xf32>
    %c0_141 = arith.constant 0 : index
    %c99_142 = arith.constant 99 : index
    %326 = vector.load %arg9[%c0_141, %c99_142] : memref<1x358xf32, #tpu.memory_space<vmem>>, vector<1x256xf32>
    %327 = vector.broadcast %321 : f32 to vector<1x256xf32>
    %328 = arith.mulf %327, %326 : vector<1x256xf32>
    %329 = arith.addf %325, %328 : vector<1x256xf32>
    %330 = arith.mulf %258, %329 : vector<1x256xf32>
    %331 = arith.addf %257, %330 : vector<1x256xf32>
    %c4 = arith.constant 4 : index
    %c0_143 = arith.constant 0 : index
    %332 = vector.load %arg4[%c4, %c0_143] : memref<7x256xf32, #tpu.memory_space<vmem>>, vector<1x256xf32>
    %cst_144 = arith.constant 0.000000e+00 : f32
    %333 = vector.broadcast %cst_144 : f32 to vector<1x256xf32>
    %c4_145 = arith.constant 4 : index
    %334 = memref.load %arg5[%c4_145] : memref<98xf32, #tpu.memory_space<smem>>
    %c53 = arith.constant 53 : index
    %335 = memref.load %arg5[%c53] : memref<98xf32, #tpu.memory_space<smem>>
    %c0_146 = arith.constant 0 : index
    %c4_147 = arith.constant 4 : index
    %336 = vector.load %arg8[%c0_146, %c4_147] : memref<1x358xf32, #tpu.memory_space<vmem>>, vector<1x256xf32>
    %337 = vector.broadcast %334 : f32 to vector<1x256xf32>
    %338 = arith.mulf %337, %336 : vector<1x256xf32>
    %339 = arith.addf %333, %338 : vector<1x256xf32>
    %c0_148 = arith.constant 0 : index
    %c4_149 = arith.constant 4 : index
    %340 = vector.load %arg9[%c0_148, %c4_149] : memref<1x358xf32, #tpu.memory_space<vmem>>, vector<1x256xf32>
    %341 = vector.broadcast %335 : f32 to vector<1x256xf32>
    %342 = arith.mulf %341, %340 : vector<1x256xf32>
    %343 = arith.addf %339, %342 : vector<1x256xf32>
    %c11 = arith.constant 11 : index
    %344 = memref.load %arg5[%c11] : memref<98xf32, #tpu.memory_space<smem>>
    %c60 = arith.constant 60 : index
    %345 = memref.load %arg5[%c60] : memref<98xf32, #tpu.memory_space<smem>>
    %c0_150 = arith.constant 0 : index
    %c20 = arith.constant 20 : index
    %346 = vector.load %arg8[%c0_150, %c20] : memref<1x358xf32, #tpu.memory_space<vmem>>, vector<1x256xf32>
    %347 = vector.broadcast %344 : f32 to vector<1x256xf32>
    %348 = arith.mulf %347, %346 : vector<1x256xf32>
    %349 = arith.addf %343, %348 : vector<1x256xf32>
    %c0_151 = arith.constant 0 : index
    %c20_152 = arith.constant 20 : index
    %350 = vector.load %arg9[%c0_151, %c20_152] : memref<1x358xf32, #tpu.memory_space<vmem>>, vector<1x256xf32>
    %351 = vector.broadcast %345 : f32 to vector<1x256xf32>
    %352 = arith.mulf %351, %350 : vector<1x256xf32>
    %353 = arith.addf %349, %352 : vector<1x256xf32>
    %c18_153 = arith.constant 18 : index
    %354 = memref.load %arg5[%c18_153] : memref<98xf32, #tpu.memory_space<smem>>
    %c67_154 = arith.constant 67 : index
    %355 = memref.load %arg5[%c67_154] : memref<98xf32, #tpu.memory_space<smem>>
    %c0_155 = arith.constant 0 : index
    %c36_156 = arith.constant 36 : index
    %356 = vector.load %arg8[%c0_155, %c36_156] : memref<1x358xf32, #tpu.memory_space<vmem>>, vector<1x256xf32>
    %357 = vector.broadcast %354 : f32 to vector<1x256xf32>
    %358 = arith.mulf %357, %356 : vector<1x256xf32>
    %359 = arith.addf %353, %358 : vector<1x256xf32>
    %c0_157 = arith.constant 0 : index
    %c36_158 = arith.constant 36 : index
    %360 = vector.load %arg9[%c0_157, %c36_158] : memref<1x358xf32, #tpu.memory_space<vmem>>, vector<1x256xf32>
    %361 = vector.broadcast %355 : f32 to vector<1x256xf32>
    %362 = arith.mulf %361, %360 : vector<1x256xf32>
    %363 = arith.addf %359, %362 : vector<1x256xf32>
    %c25 = arith.constant 25 : index
    %364 = memref.load %arg5[%c25] : memref<98xf32, #tpu.memory_space<smem>>
    %c74 = arith.constant 74 : index
    %365 = memref.load %arg5[%c74] : memref<98xf32, #tpu.memory_space<smem>>
    %c0_159 = arith.constant 0 : index
    %c52_160 = arith.constant 52 : index
    %366 = vector.load %arg8[%c0_159, %c52_160] : memref<1x358xf32, #tpu.memory_space<vmem>>, vector<1x256xf32>
    %367 = vector.broadcast %364 : f32 to vector<1x256xf32>
    %368 = arith.mulf %367, %366 : vector<1x256xf32>
    %369 = arith.addf %363, %368 : vector<1x256xf32>
    %c0_161 = arith.constant 0 : index
    %c52_162 = arith.constant 52 : index
    %370 = vector.load %arg9[%c0_161, %c52_162] : memref<1x358xf32, #tpu.memory_space<vmem>>, vector<1x256xf32>
    %371 = vector.broadcast %365 : f32 to vector<1x256xf32>
    %372 = arith.mulf %371, %370 : vector<1x256xf32>
    %373 = arith.addf %369, %372 : vector<1x256xf32>
    %c32_163 = arith.constant 32 : index
    %374 = memref.load %arg5[%c32_163] : memref<98xf32, #tpu.memory_space<smem>>
    %c81_164 = arith.constant 81 : index
    %375 = memref.load %arg5[%c81_164] : memref<98xf32, #tpu.memory_space<smem>>
    %c0_165 = arith.constant 0 : index
    %c68 = arith.constant 68 : index
    %376 = vector.load %arg8[%c0_165, %c68] : memref<1x358xf32, #tpu.memory_space<vmem>>, vector<1x256xf32>
    %377 = vector.broadcast %374 : f32 to vector<1x256xf32>
    %378 = arith.mulf %377, %376 : vector<1x256xf32>
    %379 = arith.addf %373, %378 : vector<1x256xf32>
    %c0_166 = arith.constant 0 : index
    %c68_167 = arith.constant 68 : index
    %380 = vector.load %arg9[%c0_166, %c68_167] : memref<1x358xf32, #tpu.memory_space<vmem>>, vector<1x256xf32>
    %381 = vector.broadcast %375 : f32 to vector<1x256xf32>
    %382 = arith.mulf %381, %380 : vector<1x256xf32>
    %383 = arith.addf %379, %382 : vector<1x256xf32>
    %c39 = arith.constant 39 : index
    %384 = memref.load %arg5[%c39] : memref<98xf32, #tpu.memory_space<smem>>
    %c88 = arith.constant 88 : index
    %385 = memref.load %arg5[%c88] : memref<98xf32, #tpu.memory_space<smem>>
    %c0_168 = arith.constant 0 : index
    %c84_169 = arith.constant 84 : index
    %386 = vector.load %arg8[%c0_168, %c84_169] : memref<1x358xf32, #tpu.memory_space<vmem>>, vector<1x256xf32>
    %387 = vector.broadcast %384 : f32 to vector<1x256xf32>
    %388 = arith.mulf %387, %386 : vector<1x256xf32>
    %389 = arith.addf %383, %388 : vector<1x256xf32>
    %c0_170 = arith.constant 0 : index
    %c84_171 = arith.constant 84 : index
    %390 = vector.load %arg9[%c0_170, %c84_171] : memref<1x358xf32, #tpu.memory_space<vmem>>, vector<1x256xf32>
    %391 = vector.broadcast %385 : f32 to vector<1x256xf32>
    %392 = arith.mulf %391, %390 : vector<1x256xf32>
    %393 = arith.addf %389, %392 : vector<1x256xf32>
    %c46 = arith.constant 46 : index
    %394 = memref.load %arg5[%c46] : memref<98xf32, #tpu.memory_space<smem>>
    %c95 = arith.constant 95 : index
    %395 = memref.load %arg5[%c95] : memref<98xf32, #tpu.memory_space<smem>>
    %c0_172 = arith.constant 0 : index
    %c100 = arith.constant 100 : index
    %396 = vector.load %arg8[%c0_172, %c100] : memref<1x358xf32, #tpu.memory_space<vmem>>, vector<1x256xf32>
    %397 = vector.broadcast %394 : f32 to vector<1x256xf32>
    %398 = arith.mulf %397, %396 : vector<1x256xf32>
    %399 = arith.addf %393, %398 : vector<1x256xf32>
    %c0_173 = arith.constant 0 : index
    %c100_174 = arith.constant 100 : index
    %400 = vector.load %arg9[%c0_173, %c100_174] : memref<1x358xf32, #tpu.memory_space<vmem>>, vector<1x256xf32>
    %401 = vector.broadcast %395 : f32 to vector<1x256xf32>
    %402 = arith.mulf %401, %400 : vector<1x256xf32>
    %403 = arith.addf %399, %402 : vector<1x256xf32>
    %404 = arith.mulf %332, %403 : vector<1x256xf32>
    %405 = arith.addf %331, %404 : vector<1x256xf32>
    %c5 = arith.constant 5 : index
    %c0_175 = arith.constant 0 : index
    %406 = vector.load %arg4[%c5, %c0_175] : memref<7x256xf32, #tpu.memory_space<vmem>>, vector<1x256xf32>
    %cst_176 = arith.constant 0.000000e+00 : f32
    %407 = vector.broadcast %cst_176 : f32 to vector<1x256xf32>
    %c5_177 = arith.constant 5 : index
    %408 = memref.load %arg5[%c5_177] : memref<98xf32, #tpu.memory_space<smem>>
    %c54 = arith.constant 54 : index
    %409 = memref.load %arg5[%c54] : memref<98xf32, #tpu.memory_space<smem>>
    %c0_178 = arith.constant 0 : index
    %c5_179 = arith.constant 5 : index
    %410 = vector.load %arg8[%c0_178, %c5_179] : memref<1x358xf32, #tpu.memory_space<vmem>>, vector<1x256xf32>
    %411 = vector.broadcast %408 : f32 to vector<1x256xf32>
    %412 = arith.mulf %411, %410 : vector<1x256xf32>
    %413 = arith.addf %407, %412 : vector<1x256xf32>
    %c0_180 = arith.constant 0 : index
    %c5_181 = arith.constant 5 : index
    %414 = vector.load %arg9[%c0_180, %c5_181] : memref<1x358xf32, #tpu.memory_space<vmem>>, vector<1x256xf32>
    %415 = vector.broadcast %409 : f32 to vector<1x256xf32>
    %416 = arith.mulf %415, %414 : vector<1x256xf32>
    %417 = arith.addf %413, %416 : vector<1x256xf32>
    %c12 = arith.constant 12 : index
    %418 = memref.load %arg5[%c12] : memref<98xf32, #tpu.memory_space<smem>>
    %c61 = arith.constant 61 : index
    %419 = memref.load %arg5[%c61] : memref<98xf32, #tpu.memory_space<smem>>
    %c0_182 = arith.constant 0 : index
    %c21_183 = arith.constant 21 : index
    %420 = vector.load %arg8[%c0_182, %c21_183] : memref<1x358xf32, #tpu.memory_space<vmem>>, vector<1x256xf32>
    %421 = vector.broadcast %418 : f32 to vector<1x256xf32>
    %422 = arith.mulf %421, %420 : vector<1x256xf32>
    %423 = arith.addf %417, %422 : vector<1x256xf32>
    %c0_184 = arith.constant 0 : index
    %c21_185 = arith.constant 21 : index
    %424 = vector.load %arg9[%c0_184, %c21_185] : memref<1x358xf32, #tpu.memory_space<vmem>>, vector<1x256xf32>
    %425 = vector.broadcast %419 : f32 to vector<1x256xf32>
    %426 = arith.mulf %425, %424 : vector<1x256xf32>
    %427 = arith.addf %423, %426 : vector<1x256xf32>
    %c19_186 = arith.constant 19 : index
    %428 = memref.load %arg5[%c19_186] : memref<98xf32, #tpu.memory_space<smem>>
    %c68_187 = arith.constant 68 : index
    %429 = memref.load %arg5[%c68_187] : memref<98xf32, #tpu.memory_space<smem>>
    %c0_188 = arith.constant 0 : index
    %c37_189 = arith.constant 37 : index
    %430 = vector.load %arg8[%c0_188, %c37_189] : memref<1x358xf32, #tpu.memory_space<vmem>>, vector<1x256xf32>
    %431 = vector.broadcast %428 : f32 to vector<1x256xf32>
    %432 = arith.mulf %431, %430 : vector<1x256xf32>
    %433 = arith.addf %427, %432 : vector<1x256xf32>
    %c0_190 = arith.constant 0 : index
    %c37_191 = arith.constant 37 : index
    %434 = vector.load %arg9[%c0_190, %c37_191] : memref<1x358xf32, #tpu.memory_space<vmem>>, vector<1x256xf32>
    %435 = vector.broadcast %429 : f32 to vector<1x256xf32>
    %436 = arith.mulf %435, %434 : vector<1x256xf32>
    %437 = arith.addf %433, %436 : vector<1x256xf32>
    %c26 = arith.constant 26 : index
    %438 = memref.load %arg5[%c26] : memref<98xf32, #tpu.memory_space<smem>>
    %c75 = arith.constant 75 : index
    %439 = memref.load %arg5[%c75] : memref<98xf32, #tpu.memory_space<smem>>
    %c0_192 = arith.constant 0 : index
    %c53_193 = arith.constant 53 : index
    %440 = vector.load %arg8[%c0_192, %c53_193] : memref<1x358xf32, #tpu.memory_space<vmem>>, vector<1x256xf32>
    %441 = vector.broadcast %438 : f32 to vector<1x256xf32>
    %442 = arith.mulf %441, %440 : vector<1x256xf32>
    %443 = arith.addf %437, %442 : vector<1x256xf32>
    %c0_194 = arith.constant 0 : index
    %c53_195 = arith.constant 53 : index
    %444 = vector.load %arg9[%c0_194, %c53_195] : memref<1x358xf32, #tpu.memory_space<vmem>>, vector<1x256xf32>
    %445 = vector.broadcast %439 : f32 to vector<1x256xf32>
    %446 = arith.mulf %445, %444 : vector<1x256xf32>
    %447 = arith.addf %443, %446 : vector<1x256xf32>
    %c33_196 = arith.constant 33 : index
    %448 = memref.load %arg5[%c33_196] : memref<98xf32, #tpu.memory_space<smem>>
    %c82_197 = arith.constant 82 : index
    %449 = memref.load %arg5[%c82_197] : memref<98xf32, #tpu.memory_space<smem>>
    %c0_198 = arith.constant 0 : index
    %c69 = arith.constant 69 : index
    %450 = vector.load %arg8[%c0_198, %c69] : memref<1x358xf32, #tpu.memory_space<vmem>>, vector<1x256xf32>
    %451 = vector.broadcast %448 : f32 to vector<1x256xf32>
    %452 = arith.mulf %451, %450 : vector<1x256xf32>
    %453 = arith.addf %447, %452 : vector<1x256xf32>
    %c0_199 = arith.constant 0 : index
    %c69_200 = arith.constant 69 : index
    %454 = vector.load %arg9[%c0_199, %c69_200] : memref<1x358xf32, #tpu.memory_space<vmem>>, vector<1x256xf32>
    %455 = vector.broadcast %449 : f32 to vector<1x256xf32>
    %456 = arith.mulf %455, %454 : vector<1x256xf32>
    %457 = arith.addf %453, %456 : vector<1x256xf32>
    %c40 = arith.constant 40 : index
    %458 = memref.load %arg5[%c40] : memref<98xf32, #tpu.memory_space<smem>>
    %c89 = arith.constant 89 : index
    %459 = memref.load %arg5[%c89] : memref<98xf32, #tpu.memory_space<smem>>
    %c0_201 = arith.constant 0 : index
    %c85_202 = arith.constant 85 : index
    %460 = vector.load %arg8[%c0_201, %c85_202] : memref<1x358xf32, #tpu.memory_space<vmem>>, vector<1x256xf32>
    %461 = vector.broadcast %458 : f32 to vector<1x256xf32>
    %462 = arith.mulf %461, %460 : vector<1x256xf32>
    %463 = arith.addf %457, %462 : vector<1x256xf32>
    %c0_203 = arith.constant 0 : index
    %c85_204 = arith.constant 85 : index
    %464 = vector.load %arg9[%c0_203, %c85_204] : memref<1x358xf32, #tpu.memory_space<vmem>>, vector<1x256xf32>
    %465 = vector.broadcast %459 : f32 to vector<1x256xf32>
    %466 = arith.mulf %465, %464 : vector<1x256xf32>
    %467 = arith.addf %463, %466 : vector<1x256xf32>
    %c47 = arith.constant 47 : index
    %468 = memref.load %arg5[%c47] : memref<98xf32, #tpu.memory_space<smem>>
    %c96_205 = arith.constant 96 : index
    %469 = memref.load %arg5[%c96_205] : memref<98xf32, #tpu.memory_space<smem>>
    %c0_206 = arith.constant 0 : index
    %c101 = arith.constant 101 : index
    %470 = vector.load %arg8[%c0_206, %c101] : memref<1x358xf32, #tpu.memory_space<vmem>>, vector<1x256xf32>
    %471 = vector.broadcast %468 : f32 to vector<1x256xf32>
    %472 = arith.mulf %471, %470 : vector<1x256xf32>
    %473 = arith.addf %467, %472 : vector<1x256xf32>
    %c0_207 = arith.constant 0 : index
    %c101_208 = arith.constant 101 : index
    %474 = vector.load %arg9[%c0_207, %c101_208] : memref<1x358xf32, #tpu.memory_space<vmem>>, vector<1x256xf32>
    %475 = vector.broadcast %469 : f32 to vector<1x256xf32>
    %476 = arith.mulf %475, %474 : vector<1x256xf32>
    %477 = arith.addf %473, %476 : vector<1x256xf32>
    %478 = arith.mulf %406, %477 : vector<1x256xf32>
    %479 = arith.addf %405, %478 : vector<1x256xf32>
    %c6 = arith.constant 6 : index
    %c0_209 = arith.constant 0 : index
    %480 = vector.load %arg4[%c6, %c0_209] : memref<7x256xf32, #tpu.memory_space<vmem>>, vector<1x256xf32>
    %cst_210 = arith.constant 0.000000e+00 : f32
    %481 = vector.broadcast %cst_210 : f32 to vector<1x256xf32>
    %c6_211 = arith.constant 6 : index
    %482 = memref.load %arg5[%c6_211] : memref<98xf32, #tpu.memory_space<smem>>
    %c55 = arith.constant 55 : index
    %483 = memref.load %arg5[%c55] : memref<98xf32, #tpu.memory_space<smem>>
    %c0_212 = arith.constant 0 : index
    %c6_213 = arith.constant 6 : index
    %484 = vector.load %arg8[%c0_212, %c6_213] : memref<1x358xf32, #tpu.memory_space<vmem>>, vector<1x256xf32>
    %485 = vector.broadcast %482 : f32 to vector<1x256xf32>
    %486 = arith.mulf %485, %484 : vector<1x256xf32>
    %487 = arith.addf %481, %486 : vector<1x256xf32>
    %c0_214 = arith.constant 0 : index
    %c6_215 = arith.constant 6 : index
    %488 = vector.load %arg9[%c0_214, %c6_215] : memref<1x358xf32, #tpu.memory_space<vmem>>, vector<1x256xf32>
    %489 = vector.broadcast %483 : f32 to vector<1x256xf32>
    %490 = arith.mulf %489, %488 : vector<1x256xf32>
    %491 = arith.addf %487, %490 : vector<1x256xf32>
    %c13 = arith.constant 13 : index
    %492 = memref.load %arg5[%c13] : memref<98xf32, #tpu.memory_space<smem>>
    %c62 = arith.constant 62 : index
    %493 = memref.load %arg5[%c62] : memref<98xf32, #tpu.memory_space<smem>>
    %c0_216 = arith.constant 0 : index
    %c22_217 = arith.constant 22 : index
    %494 = vector.load %arg8[%c0_216, %c22_217] : memref<1x358xf32, #tpu.memory_space<vmem>>, vector<1x256xf32>
    %495 = vector.broadcast %492 : f32 to vector<1x256xf32>
    %496 = arith.mulf %495, %494 : vector<1x256xf32>
    %497 = arith.addf %491, %496 : vector<1x256xf32>
    %c0_218 = arith.constant 0 : index
    %c22_219 = arith.constant 22 : index
    %498 = vector.load %arg9[%c0_218, %c22_219] : memref<1x358xf32, #tpu.memory_space<vmem>>, vector<1x256xf32>
    %499 = vector.broadcast %493 : f32 to vector<1x256xf32>
    %500 = arith.mulf %499, %498 : vector<1x256xf32>
    %501 = arith.addf %497, %500 : vector<1x256xf32>
    %c20_220 = arith.constant 20 : index
    %502 = memref.load %arg5[%c20_220] : memref<98xf32, #tpu.memory_space<smem>>
    %c69_221 = arith.constant 69 : index
    %503 = memref.load %arg5[%c69_221] : memref<98xf32, #tpu.memory_space<smem>>
    %c0_222 = arith.constant 0 : index
    %c38_223 = arith.constant 38 : index
    %504 = vector.load %arg8[%c0_222, %c38_223] : memref<1x358xf32, #tpu.memory_space<vmem>>, vector<1x256xf32>
    %505 = vector.broadcast %502 : f32 to vector<1x256xf32>
    %506 = arith.mulf %505, %504 : vector<1x256xf32>
    %507 = arith.addf %501, %506 : vector<1x256xf32>
    %c0_224 = arith.constant 0 : index
    %c38_225 = arith.constant 38 : index
    %508 = vector.load %arg9[%c0_224, %c38_225] : memref<1x358xf32, #tpu.memory_space<vmem>>, vector<1x256xf32>
    %509 = vector.broadcast %503 : f32 to vector<1x256xf32>
    %510 = arith.mulf %509, %508 : vector<1x256xf32>
    %511 = arith.addf %507, %510 : vector<1x256xf32>
    %c27 = arith.constant 27 : index
    %512 = memref.load %arg5[%c27] : memref<98xf32, #tpu.memory_space<smem>>
    %c76 = arith.constant 76 : index
    %513 = memref.load %arg5[%c76] : memref<98xf32, #tpu.memory_space<smem>>
    %c0_226 = arith.constant 0 : index
    %c54_227 = arith.constant 54 : index
    %514 = vector.load %arg8[%c0_226, %c54_227] : memref<1x358xf32, #tpu.memory_space<vmem>>, vector<1x256xf32>
    %515 = vector.broadcast %512 : f32 to vector<1x256xf32>
    %516 = arith.mulf %515, %514 : vector<1x256xf32>
    %517 = arith.addf %511, %516 : vector<1x256xf32>
    %c0_228 = arith.constant 0 : index
    %c54_229 = arith.constant 54 : index
    %518 = vector.load %arg9[%c0_228, %c54_229] : memref<1x358xf32, #tpu.memory_space<vmem>>, vector<1x256xf32>
    %519 = vector.broadcast %513 : f32 to vector<1x256xf32>
    %520 = arith.mulf %519, %518 : vector<1x256xf32>
    %521 = arith.addf %517, %520 : vector<1x256xf32>
    %c34_230 = arith.constant 34 : index
    %522 = memref.load %arg5[%c34_230] : memref<98xf32, #tpu.memory_space<smem>>
    %c83_231 = arith.constant 83 : index
    %523 = memref.load %arg5[%c83_231] : memref<98xf32, #tpu.memory_space<smem>>
    %c0_232 = arith.constant 0 : index
    %c70_233 = arith.constant 70 : index
    %524 = vector.load %arg8[%c0_232, %c70_233] : memref<1x358xf32, #tpu.memory_space<vmem>>, vector<1x256xf32>
    %525 = vector.broadcast %522 : f32 to vector<1x256xf32>
    %526 = arith.mulf %525, %524 : vector<1x256xf32>
    %527 = arith.addf %521, %526 : vector<1x256xf32>
    %c0_234 = arith.constant 0 : index
    %c70_235 = arith.constant 70 : index
    %528 = vector.load %arg9[%c0_234, %c70_235] : memref<1x358xf32, #tpu.memory_space<vmem>>, vector<1x256xf32>
    %529 = vector.broadcast %523 : f32 to vector<1x256xf32>
    %530 = arith.mulf %529, %528 : vector<1x256xf32>
    %531 = arith.addf %527, %530 : vector<1x256xf32>
    %c41 = arith.constant 41 : index
    %532 = memref.load %arg5[%c41] : memref<98xf32, #tpu.memory_space<smem>>
    %c90 = arith.constant 90 : index
    %533 = memref.load %arg5[%c90] : memref<98xf32, #tpu.memory_space<smem>>
    %c0_236 = arith.constant 0 : index
    %c86_237 = arith.constant 86 : index
    %534 = vector.load %arg8[%c0_236, %c86_237] : memref<1x358xf32, #tpu.memory_space<vmem>>, vector<1x256xf32>
    %535 = vector.broadcast %532 : f32 to vector<1x256xf32>
    %536 = arith.mulf %535, %534 : vector<1x256xf32>
    %537 = arith.addf %531, %536 : vector<1x256xf32>
    %c0_238 = arith.constant 0 : index
    %c86_239 = arith.constant 86 : index
    %538 = vector.load %arg9[%c0_238, %c86_239] : memref<1x358xf32, #tpu.memory_space<vmem>>, vector<1x256xf32>
    %539 = vector.broadcast %533 : f32 to vector<1x256xf32>
    %540 = arith.mulf %539, %538 : vector<1x256xf32>
    %541 = arith.addf %537, %540 : vector<1x256xf32>
    %c48_240 = arith.constant 48 : index
    %542 = memref.load %arg5[%c48_240] : memref<98xf32, #tpu.memory_space<smem>>
    %c97_241 = arith.constant 97 : index
    %543 = memref.load %arg5[%c97_241] : memref<98xf32, #tpu.memory_space<smem>>
    %c0_242 = arith.constant 0 : index
    %c102 = arith.constant 102 : index
    %544 = vector.load %arg8[%c0_242, %c102] : memref<1x358xf32, #tpu.memory_space<vmem>>, vector<1x256xf32>
    %545 = vector.broadcast %542 : f32 to vector<1x256xf32>
    %546 = arith.mulf %545, %544 : vector<1x256xf32>
    %547 = arith.addf %541, %546 : vector<1x256xf32>
    %c0_243 = arith.constant 0 : index
    %c102_244 = arith.constant 102 : index
    %548 = vector.load %arg9[%c0_243, %c102_244] : memref<1x358xf32, #tpu.memory_space<vmem>>, vector<1x256xf32>
    %549 = vector.broadcast %543 : f32 to vector<1x256xf32>
    %550 = arith.mulf %549, %548 : vector<1x256xf32>
    %551 = arith.addf %547, %550 : vector<1x256xf32>
    %552 = arith.mulf %480, %551 : vector<1x256xf32>
    %553 = arith.addf %479, %552 : vector<1x256xf32>
    %554 = arith.negf %553 : vector<1x256xf32>
    %555 = math.exp %554 : vector<1x256xf32>
    %cst_245 = arith.constant 1.000000e+00 : f32
    %556 = vector.broadcast %cst_245 : f32 to vector<1x256xf32>
    %557 = arith.addf %556, %555 : vector<1x256xf32>
    %558 = arith.divf %556, %557 : vector<1x256xf32>
    %c0_246 = arith.constant 0 : index
    %c0_247 = arith.constant 0 : index
    %c0_248 = arith.constant 0 : index
    %559 = vector.load %arg7[%c0_246, %c0_247, %c0_248] : memref<1x32x256xf32, #tpu.memory_space<vmem>>, vector<1x32x256xf32>
    %560 = vector.shape_cast %558 : vector<1x256xf32> to vector<1x1x256xf32>
    %561 = vector.broadcast %560 : vector<1x1x256xf32> to vector<1x32x256xf32>
    %562 = arith.mulf %559, %561 : vector<1x32x256xf32>
    %c0_249 = arith.constant 0 : index
    %c0_250 = arith.constant 0 : index
    %c0_251 = arith.constant 0 : index
    %563 = vector.load %arg6[%c0_249, %c0_250, %c0_251] : memref<1x32x256xf32, #tpu.memory_space<vmem>>, vector<1x32x256xf32>
    tpu.vector_store %arg6[%c0_249, %c0_250, %c0_251], %562 {strides = array<i32>} : memref<1x32x256xf32, #tpu.memory_space<vmem>>, vector<1x32x256xf32>,
    return
  }
  func.func @transform_0(%arg0: i32) -> (i32, i32, i32) {
    %c0_i32 = arith.constant 0 : i32
    %c0_i32_0 = arith.constant 0 : i32
    %c0_i32_1 = arith.constant 0 : i32
    return %arg0, %c0_i32, %c0_i32_0 : i32, i32, i32
  }
  func.func @transform_1(%arg0: i32) -> (i32, i32) {
    %c0_i32 = arith.constant 0 : i32
    %c0_i32_0 = arith.constant 0 : i32
    %c0_i32_1 = arith.constant 0 : i32
    return %c0_i32, %c0_i32_0 : i32, i32
  }
  func.func @transform_2(%arg0: i32) -> (i32, i32) {
    %c0_i32 = arith.constant 0 : i32
    %c0_i32_0 = arith.constant 0 : i32
    %c0_i32_1 = arith.constant 0 : i32
    return %c0_i32, %c0_i32_0 : i32, i32
  }
  func.func @transform_3(%arg0: i32) -> (i32, i32) {
    %c0_i32 = arith.constant 0 : i32
    %c0_i32_0 = arith.constant 0 : i32
    %c0_i32_1 = arith.constant 0 : i32
    return %c0_i32, %c0_i32_0 : i32, i32
  }
  func.func @transform_4(%arg0: i32) -> i32 {
    %c0_i32 = arith.constant 0 : i32
    %c0_i32_0 = arith.constant 0 : i32
    return %c0_i32 : i32
  }
  func.func @transform_5(%arg0: i32) -> (i32, i32, i32) {
    %c0_i32 = arith.constant 0 : i32
    %c0_i32_0 = arith.constant 0 : i32
    %c0_i32_1 = arith.constant 0 : i32
    return %arg0, %c0_i32, %c0_i32_0 : i32, i32, i32
  }
}

</mosaic_0001>

<bundles_post_ra>
// kernel: tpu_custom_call.1
= control target key start
LH: loop header
LB: loop body
LE: loop exit
PB: predicated region body
PF: predicated region fallthrough
CT: control target
= control target key end

     0   :  { %s3015_s0 = inlined_call_operand.hbm [shape: f32[2,32,256], index: 0, kind: input, shape index: {}]   ;;  %s3016_s1 = inlined_call_operand.vmem [shape: f32[32,2], index: 1, kind: input, shape index: {}]   ;;  %s3017_s2 = inlined_call_operand.vmem [shape: f32[2,32], index: 2, kind: input, shape index: {}]   ;;  %s3018_s3 = inlined_call_operand.vmem [shape: f32[7,256], index: 3, kind: input, shape index: {}]   ;;  %s3019_s4 = inlined_call_operand.vmem [shape: f32[98], index: 4, kind: input, shape index: {}]   ;;  %s3020_s5 = inlined_call_operand.hbm [shape: f32[2,32,256], index: 5, kind: output, shape index: {}]  }
   0x1   :  { %3035 = sst [smem:[#allocation20_spill]] %s3015_s0 }
   0x2   :  { %3036 = sst [smem:[#allocation21_spill]] %s3016_s1 }
   0x3   :  { %3037 = sst [smem:[#allocation22_spill]] %s3017_s2 }
   0x4   :  { %3038 = sst [smem:[#allocation23_spill]] %s3019_s4 }
   0x5   :  { %10 = vsyncpa [#allocation6], 0 }
   0x6   :  { %12 = vsyncpa [#allocation6 + $0x1], 0 }
   0x7   :  { %13 = vsyncpa [#allocation8], 0 }
   0x8   :  { %14 = vsyncpa [#allocation7], 0 }
   0x9   :  { %16 = vsyncpa [#allocation7 + $0x1], 0  ;;  %s2184_s18 = smov 0   ;;  %s2186_s19 = smov 0  }
   0xa   :  { %s2188_s20 = smov 0   ;;  %s2190_s21 = smov 0  }
   0xb LB: > { %3039 = sst [smem:[#allocation14_spill]] %s2124_s20  ;;  %s2205_s22 = sadd.s32 4294967295, %s2128_s21   ;;  %s2128_s21 = sphi %s2190_s21, %s3074_s21   ;;  %s2124_s20 = sphi %s2188_s20, %s3071_s20   ;;  %s2120_s19 = sphi %s2186_s19, %s3073_s19   ;;  %s2116_s18 = sphi %s2184_s18, %s3072_s18  }
   0xc   : > { %s1772_s23 = sadd.s32 4294967294, %s2128_s21   ;;  %s2209_s24 = sadd.s32 1, %s2128_s21  }
   0xd   : > { %s29_s25 = sadd.s32 1, %s2124_s20  ;;  %s26_s26 = ssub.s32 %s2128_s21, %s2209_s24 }
   0xe   : > { %p36_p0 = scmp.ne.s32.totalorder %s2124_s20, %s2120_s19  ;;  %p27_p1 = scmp.eq.s32.totalorder %s26_s26, 0 }
   0xf   : > { %p37_p2 = scmp.eq.s32.totalorder %s2128_s21, 0  ;;  %p42_p3 = scmp.ne.s32.totalorder %s2120_s19, %s2116_s18 }
  0x10   : > { %p3022_p4 = scmp.eq.s32.totalorder %s2205_s22, 0  ;;  %p150_p7 = scmp.eq.s32.totalorder %s2205_s22, 1 }
  0x11   : > { %s2221_s27 = scalar_select %p27_p1, %s2124_s20, %s29_s25  }
  0x12   : > { %p2223_p5 = por %p37_p2, %p36_p0  ;;  %p2229_p6 = por %p3022_p4, %p42_p3 }
  0x13   : > { %3040 = sst [smem:[#allocation15_spill]] %s2221_s27  ;;  %p156_p8 = scmp.eq.s32.totalorder %s1772_s23, 1 }
  0x14   : > { %s3042_s29 = scalar_select %p2229_p6, 1, 0 }
  0x15   : > { %p1773_p9 = scmp.ge.s32.totalorder %s2128_s21, 1  ;;  %p163_p10 = scmp.lt.s32.totalorder %s2128_s21, 3 }
  0x16   : > { %p2236_p11 = por %p150_p7, %p36_p0  ;;  %p2240_p12 = por %p156_p8, %p42_p3 }
  0x17   : > { %p2244_p13 = pnand %p1773_p9, %p163_p10  ;;  %s3046_s4 = sld [smem:[#allocation23_spill]] }
  0x18   : > { %s3043_s30 = scalar_select %p2236_p11, 1, 0 }
  0x19   : > { %s3044_s6 = scalar_select %p2240_p12, 1, 0 }
  0x1a   : > { %p1935_p1 = pneg %p2244_p13  ;;  %p1948_p2 = scmp.lt.s32.totalorder %s2128_s21, 2 }
  0x1b   : > { %s196_s12 = sand.u32 1, %s2124_s20  }
  0x1c   : > { %p2257_p7 = pnand %p1935_p1, %p3022_p4  ;;  %p2264_p3 = pnand %p1948_p2, %p2223_p5 }
  0x1d   : > { %s185_s10 = sshll.u32 %s3046_s4, 4  ;;  %s1776_s14 = sshll.u32 %s196_s12, 6  ;;  %s186_s10 = int_to_ptr.vmem [resolvable:$true] %s185_s10 }
  0x1e   : > { %s2013_s15 = scalar_lea.vmem %s186_s10, 16  ;;  %p2015_p9 = pneg %p2257_p7 }
  0x1f   : > { %p2014_p8 = scmp.ne.s32.totalorder %s186_s10, %s2013_s15  ;;  %p2021_p12 = scmp.lt.s32.totalorder %s186_s10, %s186_s10 }
  0x20   : > { %p2022_p11 = scmp.lt.s32.totalorder %s2013_s15, %s2013_s15 }
  0x21   : > { %p2016_p10 = pnand %p2015_p9, %p2014_p8 }
  0x22   : > { %p2023_p1 = por %p2022_p11, %p2021_p12 }
  0x23   : > { %p2017_p0 = pneg %p2016_p10 }
  0x25   : > { %p2024_p4 = pnand %p2023_p1, %p2017_p0 }
  0x27   : > { %2027 = shalt.err (!%p2024_p4)
}
  0x28   : > { %s2130_s16 = smov [#allocation9]   ;;  %s1896_s17 = sshll.u32 %s2128_s21, 10 }
  0x29   : > { %1938 = dma.vmem_to_smem (!%p2257_p7), %s186_s10, 16, %s2130_s16, [#allocation8]  }
  0x2a   : > { %s200_s23 = scalar_lea.vmem [#allocation5], %s1776_s14  ;;  %s3049_s0 = sld [smem:[#allocation20_spill]] }
  0x2b   : > { %s207_s25 = sshll.u32 %s200_s23, 4  ;;  %s2280_s9 = scalar_lea.sflag [#allocation6], %s196_s12  ;;  %s2278_s25 = int_to_ptr.vmem [resolvable:$true] %s207_s25 }
  0x2c   : > { %p2030_p5 = pneg %p2264_p3 }
  0x30   : > { %s2276_s8 = scalar_lea.hbm %s3049_s0, %s1896_s17  ;;  %s2033_s15 = scalar_lea.hbm %s3049_s0, 2048 }
  0x31   : > { %s2028_s11 = scalar_lea.hbm %s2276_s8, 1024  ;;  %p2034_p0 = scmp.lt.u32.totalorder %s2276_s8, %s3049_s0 }
  0x32   : > { %p2029_p4 = scmp.ne.s32.totalorder %s2276_s8, %s2028_s11  ;;  %p2035_p2 = scmp.lt.u32.totalorder %s2033_s15, %s2028_s11 }
  0x33   : > { %p2037_p8 = scmp.lt.u32.totalorder %s2028_s11, %s2276_s8 }
  0x34   : > { %p2031_p11 = pnand %p2030_p5, %p2029_p4  ;;  %p2036_p7 = por %p2035_p2, %p2034_p0 }
  0x36   : > { %p2032_p12 = pneg %p2031_p11  ;;  %p2038_p9 = por %p2037_p8, %p2036_p7 }
  0x38   : > { %p2039_p10 = pnand %p2038_p9, %p2032_p12 }
  0x3a   : > { %2042 = shalt.err (!%p2039_p10)
}
  0x3b   : > { %s2043_s12 = scalar_lea.vmem %s2278_s25, 1024  ;;  %s2131_s23 = smov [#allocation5]  }
  0x3c   : > { %p2044_p1 = scmp.ne.s32.totalorder %s2278_s25, %s2043_s12  ;;  %s2048_s26 = sshll.u32 %s2131_s23, 4  ;;  %s2049_s26 = int_to_ptr.vmem [resolvable:$false] %s2048_s26 }
  0x3d   : > { %s2050_s28 = scalar_lea.vmem %s2049_s26, 2048  ;;  %p2051_p6 = scmp.lt.s32.totalorder %s2278_s25, %s2049_s26 }
  0x3e   : > { %p2046_p4 = pnand %p2044_p1, %p2030_p5  ;;  %p2052_p0 = scmp.lt.s32.totalorder %s2050_s28, %s2043_s12 }
  0x40   : > { %p2047_p11 = pneg %p2046_p4  ;;  %p2053_p2 = por %p2052_p0, %p2051_p6 }
  0x42   : > { %p2054_p7 = pnand %p2053_p2, %p2047_p11 }
  0x44   : > { %2057 = shalt.err (!%p2054_p7)
}
  0x45   : > { %s2132_s11 = smov 256   ;;  %s2133_s10 = smov 16  }
  0x46   : > { %1942 = dma.hbm_to_vmem [thread:$0]  (!%p2264_p3), %s2276_s8, 1024, %s2278_s25, %s2280_s9, %s2132_s11, %s2132_s11, %s2133_s10  }
  0x47   : > { %219 = sbr.rel (%p2244_p13) target bundleno = 1417 (0x589), region = 40 }
  0x4e   : > { %s2311_s14 = sand.u32 1, %s2120_s19   ;;  %p3050_p6 = scmp.ne.s32.totalorder %s3042_s29, 0 }
  0x4f   : > { %s3024_s15 = sshll.u32 %s2311_s14, 6  ;;  %s222_s16 = scalar_lea.sflag [#allocation6], %s2311_s14 }
  0x50   : > { %s225_s17 = scalar_lea.vmem [#allocation5], %s3024_s15 }
  0x51   : > { %2103 = dma.done.wait (%p3050_p6), %s222_s16, 1024  }
  0x52   : > { %2105 = vsyncadd (%p3050_p6), %s222_s16, 4294966272  ;;  %p3051_p3 = scmp.eq.s32.totalorder %s2205_s22, 0 }
  0x54   : > { %2107 = dma.done.wait (%p3051_p3), [#allocation8], 16   ;;  %p3052_p13 = pmov %p3051_p3 }
  0x56   : > { %2109 = vsyncadd (%p3052_p13), [#allocation8], 4294967280 }
  0x57   : > { %234 = sfence }
  0x58   : > { %v2325_v0 = vld [vmem:[%s225_s17 + $0x20] sm:$0xff]  ;;  %v2327_v1 = vld [vmem:[%s225_s17 + $0x28] sm:$0xff]  ;;  %v2335_v5 = vld [vmem:[%s225_s17 + $0x30] sm:$0xff]  ;;  %s3053_s1 = sld [smem:[#allocation21_spill]]  ;;  %v2134_v19 = vmov 0.0|0.0   ;;  %vm2135_vm0 = vmmov 0   ;;  %v298_v24 = vlaneseq }
  0x59   : > { %v2329_v2 = vld [vmem:[%s225_s17] sm:$0xff]  ;;  %v271_v3 = vadd.f32 %v2327_v1, %v2325_v0  ;;  %v2333_v4 = vld [vmem:[%s225_s17 + $0x8] sm:$0xff]  ;;  %v2337_v6 = vld [vmem:[%s225_s17 + $0x38] sm:$0xff]  ;;  %v288_v15 = vmax.f32 %v2325_v0, %v2327_v1  ;;  %1921 = vmatprep.subr.bf16.mxu0 %v2134_v19  ;;  %v2136_v23 = vmov 0.0   ;;  %vm309_vm1 = vcmask 130112   ;;  %s3054_s2 = sld [smem:[#allocation22_spill]] }
  0x5a   : > { %v265_v7 = vadd.f32 %v2333_v4, %v2329_v2  ;;  %v2341_v8 = vld [vmem:[%s225_s17 + $0x10] sm:$0xff]  ;;  %v2343_v9 = vld [vmem:[%s225_s17 + $0x18] sm:$0xff]  ;;  %v274_v10 = vadd.f32 %v2337_v6, %v2335_v5  ;;  %v282_v13 = vmax.f32 %v2329_v2, %v2333_v4  ;;  %v291_v14 = vmax.f32 %v2335_v5, %v2337_v6  ;;  %1913 = vmatprep.mubr.msk.f32.mxu0 %vm2135_vm0, %v2136_v23  ;;  %s2138_s11 = smov 51   ;;  %s1804_s10 = sld [smem:[#allocation9 + $0x39]] }
  0x5b   : > { %272 = vadd.xlane.f32.xlu1 %v271_v3  ;;  %v268_v11 = vadd.f32 %v2343_v9, %v2341_v8  ;;  %v285_v12 = vmax.f32 %v2341_v8, %v2343_v9  ;;  %1916 = vmatprep.subr.mxu1 %v2136_v23  ;;  %v299_v25 = vand.u32 127, %v298_v24  ;;  %v2374_v29 = vshrl.u32 %v298_v24, 7  ;;  %s1819_s16 = sld [smem:[#allocation9 + $0x3a]]  ;;  %s1821_s17 = sld [smem:[#allocation9 + $0x41]] }
  0x5c   : > { %266 = vadd.xlane.f32.xlu0 %v265_v7  ;;  %1918 = vmatprep.mubr.msk.f32.mxu1 %vm2135_vm0, %v2136_v23  ;;  %vm316_vm2 = vcmask 195712   ;;  %vm323_vm3 = vcmask 261312   ;;  %vm350_vm4 = vcmask 1040384   ;;  %vm357_vm5 = vcmask 261120   ;;  %s1806_s29 = sld [smem:[#allocation9 + $0x40]]  ;;  %s1849_s7 = sld [smem:[#allocation9 + $0x3c]] }
  0x5d   : > { %v304_v27 = vadd.s32 4294967288, %v299_v25  ;;  %v311_v32 = vadd.s32 4294967280, %v299_v25  ;;  %v318_v34 = vadd.s32 4294967272, %v299_v25  ;;  %v302_v36 = vsub.s32 %v299_v25, %v2374_v29  ;;  %s1834_s13 = sld [smem:[#allocation9 + $0x3b]]  ;;  %s2439_s25 = sld [smem:[#allocation9 + $0x47]] }
  0x5e   : > { %v352_v16 = vld [vmem:[%s3053_s1] sm:$0xff]  ;;  %v353_v17 = vld [vmem:[%s3053_s1 + $0x8] sm:$0xff]  ;;  %v354_v20 = vld [vmem:[%s3053_s1 + $0x10] sm:$0xff]  ;;  %vm436_vm6 = vcmask 1041408   ;;  %vm432_vm7 = vcmask 15360   ;;  %vm604_vm8 = vcmp.lt.s32.totalorder %v298_v24, 358 }
  0x5f   : > { %275 = vadd.xlane.f32.xlu1 %v274_v10  ;;  %v1922_v18 = vpack.c.bf16 %v353_v17, %v352_v16  ;;  %v355_v21 = vld [vmem:[%s3053_s1 + $0x18] sm:$0xff]  ;;  %v307_v31 = vsub.s32 %v304_v27, %v2374_v29  ;;  %v314_v41 = vsub.s32 %v311_v32, %v2374_v29  ;;  %v321_v42 = vsub.s32 %v318_v34, %v2374_v29  ;;  %v356_v61 = vld [vmem:[%s3054_s2] sm:$0x3]  ;;  %s2441_s8 = sld [smem:[#allocation9 + $0x48]]  ;;  %s3027_s9 = smov 112  }
  0x60   : > { %269 = vadd.xlane.f32.xlu0 %v268_v11  ;;  %v1925_v22 = vpack.c.bf16 %v355_v21, %v354_v20  ;;  %1917 = vmatpush3.msk.msra.mxu1 %vm436_vm6, %v356_v61  ;;  %v3030_v16 = vsub.s32 0, %v2374_v29  ;;  %607 = vst.msk [vmem:[#allocation4] sm:$0x7] %vm604_vm8, %v2136_v23  ;;  %606 = vst.msk [vmem:[#allocation3] sm:$0x7] %vm604_vm8, %v2136_v23  ;;  %vm631_vm9 = vcmp.ge.s32.totalorder %v298_v24, 51 }
  0x61   : > { %1923 = vmatpush3.bf16.msra.mxu0 %v1922_v18  ;;  %vm632_vm10 = vcmp.lt.s32.totalorder %v298_v24, 307  ;;  %vm628_vm11 = vcmask 416768   ;;  %s2447_s12 = sld [smem:[#allocation9 + $0x42]]  ;;  %s2449_s23 = sld [smem:[#allocation9 + $0x43]]  ;;  %vm678_vm13 = vcmask 916480   ;;  %vm700_vm14 = vcmask 785408  }
  0x62   : > { %1924 = vmatprep.subr.bf16.mxu0 %v2134_v19  ;;  %vm633_vm12 = vmand %vm631_vm9, %vm632_vm10  ;;  %s2451_s26 = sld [smem:[#allocation9 + $0x3d]]  ;;  %s2453_s28 = sld [smem:[#allocation9 + $0x3e]]  ;;  %vm721_vm15 = vcmask 654336   ;;  %vm742_vm0 = vcmask 523264   ;;  %vm1488_vm6 = vcmask 1006592  }
  0x63   : > { %286 = vmax.xlane.f32.xlu1 %v285_v12  ;;  %s2473_s15 = sld [smem:[#allocation9 + $0x2]]  ;;  %s2479_s0 = sld [smem:[#allocation9 + $0x3]] }
  0x64   : > { %283 = vmax.xlane.f32.xlu0 %v282_v13  ;;  %s2481_s1 = sld [smem:[#allocation9 + $0x34]]  ;;  %s2483_s2 = sld [smem:[#allocation9 + $0x5]] }
  0x65   : > { %1926 = vmatpush3.bf16.msra.mxu0 %v1925_v22  ;;  %s2495_s4 = sld [smem:[#allocation9 + $0x6]]  ;;  %s2141_s27 = smov 80  }
  0x66   : > { %s2499_s20 = sld [smem:[#allocation9 + $0x37]]  ;;  %p3067_p12 = scmp.ne.s32.totalorder %s3043_s30, 0 }
  0x67   : > { %292 = vmax.xlane.f32.xlu1 %v291_v14 }
  0x68   : > { %289 = vmax.xlane.f32.xlu0 %v288_v15 }
  0xe8   : > { %v273_v26 = vpop.xlane.xlu1 %272 }
  0xe9   : > { %v267_v28 = vpop.xlane.xlu0 %266  ;;  %v280_v38 = vmul.f32 0.00390625, %v273_v26 }
  0xea   : > { %v278_v33 = vmul.f32 0.00390625, %v267_v28 }
  0xeb   : > { %v315_v49 = vrot.slane %v280_v38, %v314_v41 }
  0xec   : > { %v276_v30 = vpop.xlane.xlu1 %275  ;;  %v303_v44 = vrot.slane %v278_v33, %v302_v36 }
  0xed   : > { %v270_v35 = vpop.xlane.xlu0 %269  ;;  %v281_v43 = vmul.f32 0.00390625, %v276_v30 }
  0xee   : > { %v279_v37 = vmul.f32 0.00390625, %v270_v35 }
  0xef   : > { %v322_v51 = vrot.slane %v281_v43, %v321_v42  ;;  %v2137_v43 = vmov 1966171168  }
  0xf0   : > { %v308_v39 = vrot.slane %v279_v37, %v307_v31  ;;  %v287_v40 = vpop.xlane.xlu1 %286 }
  0xf1   : > { %v284_v45 = vpop.xlane.xlu0 %283  ;;  %v337_v46 = vrot.slane %v287_v40, %v307_v31 }
  0xf2   : > { %v310_v47 = vsel %vm309_vm1, %v308_v39, %v303_v44  ;;  %v333_v48 = vrot.slane %v284_v45, %v302_v36  ;;  %v612_v44 = vunpack.c.l.s4 %v2137_v43  ;;  %v1256_v43 = vstv %s2449_s23  ;;  %s2522_s23 = sld [smem:[#allocation9 + $0x44]] }
  0xf3   : > { %v317_v55 = vsel %vm316_vm2, %v315_v49, %v310_v47 }
  0xf4   : > { %v293_v50 = vpop.xlane.xlu1 %292  ;;  %v338_v56 = vsel %vm309_vm1, %v337_v46, %v333_v48  ;;  %v324_v58 = vsel %vm323_vm3, %v322_v51, %v317_v55  ;;  %vm763_vm1 = vcmask 392192  }
  0xf5   : > { %v290_v52 = vpop.xlane.xlu0 %289  ;;  %v347_v53 = vrot.slane %v293_v50, %v321_v42 }
  0xf6   : > { %v342_v54 = vrot.slane %v290_v52, %v314_v41 }
  0xf8   : > { %v343_v57 = vsel %vm316_vm2, %v342_v54, %v338_v56  ;;  %vm932_vm2 = vcmask 1039360  }
  0xf9   : > { %v348_v59 = vsel %vm323_vm3, %v347_v53, %v343_v57  ;;  %v613_v53 = vunpack.c.0.s8 %v612_v44  ;;  %vm1071_vm3 = vcmask 1031168  }
  0xfa   : > { %v351_v60 = vsel %vm350_vm4, %v324_v58, %v348_v59  ;;  %vm1210_vm4 = vcmask 1022976  }
  0xfb   : > { %1914 = vmatmul.mubr.msk.f32.vlgmr.msra.gmra.mrb[0].mxu0 %vm357_vm5, %v351_v60 }
 0x1ce   : > { %v427_v62 = vpop.f32.mrb[0].mxu0 }
 0x1cf   : > { %v431_v63 = vmax.f32 %v427_v62, 0.0  ;;  %v1915_v3 = vpop.f32.mrb[1].mxu0  ;;  %v616_v62 = vsub.s32 %v613_v53, %v2374_v29 }
 0x1d1   : > { %1919 = vmatmul.mubr.msk.f32.vlgmr.msra.gmra.mrb[0].mxu1 %vm432_vm7, %v431_v63  ;;  %vm1627_vm7 = vcmask 998400  }
 0x2a4   : > { %v506_v7 = vpop.f32.mrb[0].mxu1 }
 0x2a5   : > { %v511_v10 = vrot.slane %v506_v7, 1  ;;  %v1920_v11 = vpop.f32.mrb[1].mxu1 }
 0x2a7   : > { %v513_v12 = vadd.f32 %v511_v10, %v506_v7 }
 0x2a9   : > { %v1786_v13 = vmul.f32 -1.442695, %v513_v12 }
 0x2ab   : > { %2005 = vpow2.f32 %v1786_v13 }
 0x2b5   : > { %v2006_v14 = vpop.eup %2005 }
 0x2b6   : > { %v517_v15 = vadd.f32 1.0, %v2006_v14 }
 0x2b8   : > { %2007 = vrcp.f32 %v517_v15 }
 0x2c2   : > { %v2008_v17 = vpop.eup %2007 }
 0x2c3   : > { %v523_v18 = vrot.slane %v2008_v17, %v3030_v16 }
 0x2c5   : > { %529 = vbcast.lane.b32.xlu1 %v523_v18, 264  ;;  %525 = vbcast.lane.b32.xlu0 %v523_v18, 256 }
 0x2c9   : > { %533 = vbcast.lane.b32.xlu1 %v523_v18, 272 }
 0x2cd   : > { %537 = vbcast.lane.b32.xlu1 %v523_v18, 280 }
 0x337   : > { %v530_v19 = vpop.permute.xlu1 %529  ;;  %v526_v20 = vpop.permute.xlu0 %525 }
 0x338   : > { %v2393_v21 = vmul.f32 %v530_v19, %v2341_v8  ;;  %v2396_v22 = vmul.f32 %v530_v19, %v2343_v9  ;;  %v2399_v25 = vmul.f32 %v526_v20, %v2329_v2  ;;  %v2402_v26 = vmul.f32 %v526_v20, %v2333_v4 }
 0x33a   : > { %v563_v8 = vadd.f32 %v2393_v21, %v2399_v25  ;;  %v572_v9 = vadd.f32 %v2396_v22, %v2402_v26 }
 0x33b   : > { %v534_v27 = vpop.permute.xlu1 %533 }
 0x33c   : > { %v2405_v28 = vmul.f32 %v534_v27, %v2325_v0  ;;  %v2408_v23 = vmul.f32 %v534_v27, %v2327_v1 }
 0x33e   : > { %3055 = vst [vmem:[#allocation16_spill] sm:$0xff] %v2405_v28  ;;  %3056 = vst [vmem:[#allocation17_spill] sm:$0xff] %v2408_v23  ;;  %v564_v2 = vadd.f32 %v563_v8, %v2405_v28  ;;  %v573_v31 = vadd.f32 %v572_v9, %v2408_v23  ;;  %v584_v1 = vmax.f32 %v2399_v25, %v2405_v28 }
 0x33f   : > { %v538_v30 = vpop.permute.xlu1 %537  ;;  %v593_v32 = vmax.f32 %v2402_v26, %v2408_v23 }
 0x340   : > { %v2417_v4 = vmul.f32 %v538_v30, %v2335_v5  ;;  %v2420_v0 = vmul.f32 %v538_v30, %v2337_v6  ;;  %v819_v30 = vstv %s1804_s10  ;;  %s2457_s10 = sld [smem:[#allocation9 + $0x4e]] }
 0x342   : > { %3057 = vst [vmem:[#allocation18_spill] sm:$0xff] %v2417_v4  ;;  %3058 = vst [vmem:[#allocation19_spill] sm:$0xff] %v2420_v0  ;;  %v565_v33 = vadd.f32 %v564_v2, %v2417_v4  ;;  %v574_v34 = vadd.f32 %v573_v31, %v2420_v0  ;;  %v585_v35 = vmax.f32 %v2393_v21, %v2417_v4  ;;  %v958_v2 = vstv %s1819_s16  ;;  %s2459_s16 = sld [smem:[#allocation9 + $0x4f]] }
 0x343   : > { %v594_v5 = vmax.f32 %v2396_v22, %v2420_v0 }
 0x344   : > { %v566_v36 = vrot.slane %v565_v33, 4  ;;  %v575_v37 = vrot.slane %v574_v34, 4  ;;  %v586_v6 = vmax.f32 %v584_v1, %v585_v35 }
 0x345   : > { %v595_v38 = vmax.f32 %v593_v32, %v594_v5  ;;  %v978_v32 = vstv %s1821_s17  ;;  %v1236_v5 = vstv %s1849_s7  ;;  %s2461_s17 = sld [smem:[#allocation9 + $0x49]] }
 0x346   : > { %v567_v39 = vadd.f32 %v566_v36, %v565_v33  ;;  %v576_v40 = vadd.f32 %v575_v37, %v574_v34  ;;  %v587_v41 = vrot.slane %v586_v6, 4  ;;  %v839_v33 = vstv %s1806_s29  ;;  %s2463_s29 = sld [smem:[#allocation9 + $0x4a]]  ;;  %s2467_s7 = sld [smem:[#allocation9 + $0x1]] }
 0x347   : > { %v596_v42 = vrot.slane %v595_v38, 4  ;;  %v1097_v36 = vstv %s1834_s13  ;;  %s2471_s13 = sld [smem:[#allocation9 + $0x32]] }
 0x348   : > { %v568_v45 = vrot.slane %v567_v39, 2  ;;  %v577_v46 = vrot.slane %v576_v40, 2  ;;  %v588_v47 = vmax.f32 %v586_v6, %v587_v41 }
 0x349   : > { %v597_v48 = vmax.f32 %v595_v38, %v596_v42  ;;  %v859_v38 = vstv %s2439_s25  ;;  %s2487_s25 = sld [smem:[#allocation9 + $0x36]]  ;;  %v1117_v42 = vstv %s2447_s12  ;;  %s3059_s12 = smov 96  }
 0x34a   : > { %v569_v49 = vadd.f32 %v568_v45, %v567_v39  ;;  %v578_v50 = vadd.f32 %v577_v46, %v576_v40  ;;  %v589_v51 = vrot.slane %v588_v47, 2  ;;  %v998_v39 = vstv %s2441_s8  ;;  %s2489_s8 = sld [smem:[#allocation9 + $0x4]] }
 0x34b   : > { %v598_v52 = vrot.slane %v597_v48, 2  ;;  %v1375_v46 = vstv %s2451_s26  ;;  %s2524_s26 = sld [smem:[#allocation9 + $0x45]] }
 0x34c   : > { %v570_v54 = vrot.slane %v569_v49, 1  ;;  %v579_v55 = vrot.slane %v578_v50, 1  ;;  %v590_v56 = vmax.f32 %v588_v47, %v589_v51  ;;  %v1514_v47 = vstv %s2453_s28  ;;  %s3060_s28 = smov 112  }
 0x34d   : > { %v599_v57 = vmax.f32 %v597_v48, %v598_v52  ;;  %v879_v48 = vstv %s2457_s10  ;;  %v1276_v51 = vstv %s2463_s29  ;;  %v802_v52 = vstv %s2467_s7  ;;  %s1844_s10 = sld [smem:[#allocation9 + $0x5e]]  ;;  %s1872_s29 = sld [smem:[#allocation9 + $0x59]] }
 0x34e   : > { %v591_v58 = vrot.slane %v590_v56, 1  ;;  %v571_v60 = vadd.f32 %v570_v54, %v569_v49  ;;  %v580_v61 = vadd.f32 %v579_v55, %v578_v50  ;;  %v1018_v49 = vstv %s2459_s16  ;;  %s2143_s16 = smov 48   ;;  %s1870_s7 = sld [smem:[#allocation9 + $0x52]] }
 0x34f   : > { %v600_v59 = vrot.slane %v599_v57, 1  ;;  %v1137_v50 = vstv %s2461_s17  ;;  %v805_v54 = vstv %s2471_s13  ;;  %v941_v55 = vstv %s2473_s15  ;;  %s1868_s15 = sld [smem:[#allocation9 + $0x4b]]  ;;  %s1842_s17 = sld [smem:[#allocation9 + $0x57]] }
 0x350   : > { %v592_v63 = vmax.f32 %v590_v56, %v591_v58  ;;  %v582_v7 = vmul.f32 0.03125, %v571_v60  ;;  %v583_v10 = vmul.f32 0.03125, %v580_v61  ;;  %v1083_v60 = vstv %s2481_s1  ;;  %s1827_s1 = sld [smem:[#allocation9 + $0x56]]  ;;  %s1859_s13 = sld [smem:[#allocation9 + $0x5f]] }
 0x351   : > { %v601_v3 = vmax.f32 %v599_v57, %v600_v59  ;;  %v1080_v57 = vstv %s2479_s0  ;;  %v1358_v61 = vstv %s2483_s2  ;;  %s2545_s0 = sld [smem:[#allocation9 + $0x55]]  ;;  %s2142_s2 = smov 64  }
 0x352   : > { %v610_v12 = vcombine.low %v582_v7, %v583_v10  ;;  %v1497_v7 = vstv %s2495_s4  ;;  %s1840_s4 = sld [smem:[#allocation9 + $0x50]] }
 0x353   : > { %v637_v11 = vcombine.low %v592_v63, %v601_v3  ;;  %v1219_v63 = vstv %s2489_s8  ;;  %s1803_s8 = sld [smem:[#allocation9 + $0x8]] }
 0x354   : > { %v617_v14 = vrot.slane %v610_v12, %v616_v62 }
 0x355   : > { %v644_v13 = vrot.slane %v637_v11, %v616_v62 }
 0x356   : > { %v624_v17 = vrot.slane %v617_v14, %v616_v62 }
 0x357   : > { %v651_v15 = vrot.slane %v644_v13, %v616_v62  ;;  %v1361_v62 = vstv %s2487_s25  ;;  %v1500_v13 = vstv %s2499_s20  ;;  %s1855_s20 = sld [smem:[#allocation9 + $0x51]]  ;;  %s1829_s25 = sld [smem:[#allocation9 + $0x5d]] }
 0x358   : > { %625 = vrot.lane.b32.xlu0 %v624_v17, %s2138_s11 }
 0x359   : > { %652 = vrot.lane.b32.xlu1 %v651_v15, %s2138_s11  ;;  %s3025_s11 = smov 96  }
 0x3ca   : > { %v626_v19 = vpop.permute.xlu0 %625 }
 0x3cb   : > { %v653_v18 = vpop.permute.xlu1 %652  ;;  %v627_v27 = vrot.slane %v626_v19, 7 }
 0x3cc   : > { %v654_v20 = vrot.slane %v653_v18, 7 }
 0x3cd   : > { %v629_v9 = vsel %vm628_vm11, %v627_v27, %v626_v19 }
 0x3ce   : > { %v655_v8 = vsel %vm628_vm11, %v654_v20, %v653_v18  ;;  %634 = vst.msk [vmem:[#allocation3] sm:$0x7] %vm633_vm12, %v629_v9 }
 0x3cf   : > { %657 = vst.msk [vmem:[#allocation4] sm:$0x7] %vm633_vm12, %v655_v8 }
 0x3d5   : > { %v2512_v53 = vld [vmem:[#allocation3] sm:$0x7] }
 0x3d6   : > { %v2435_v31 = vld [vmem:[#allocation4] sm:$0x7]  ;;  %v803_v11 = vmul.f32 %v802_v52, %v2512_v53  ;;  %v942_v15 = vmul.f32 %v941_v55, %v2512_v53  ;;  %v1081_v18 = vmul.f32 %v1080_v57, %v2512_v53  ;;  %v1359_v27 = vmul.f32 %v1358_v61, %v2512_v53 }
 0x3d7   : > { %v820_v24 = vmul.f32 %v819_v30, %v2435_v31  ;;  %v959_v1 = vmul.f32 %v958_v2, %v2435_v31  ;;  %v979_v34 = vmul.f32 %v978_v32, %v2435_v31  ;;  %v840_v35 = vmul.f32 %v839_v33, %v2435_v31 }
 0x3d8   : > { %v1237_v37 = vmul.f32 %v1236_v5, %v2435_v31  ;;  %v1098_v6 = vmul.f32 %v1097_v36, %v2435_v31  ;;  %v860_v40 = vmul.f32 %v859_v38, %v2435_v31  ;;  %v999_v41 = vmul.f32 %v998_v39, %v2435_v31 }
 0x3d9   : > { %822 = vrot.lane.b32.xlu1 %v820_v24, %s3027_s9  ;;  %961 = vrot.lane.b32.xlu0 %v959_v1, %s3027_s9  ;;  %v1118_v44 = vmul.f32 %v1117_v42, %v2435_v31  ;;  %v1257_v45 = vmul.f32 %v1256_v43, %v2435_v31  ;;  %v1376_v58 = vmul.f32 %v1375_v46, %v2435_v31  ;;  %v1177_v57 = vstv %s1842_s17  ;;  %s1822_s17 = sld [smem:[#allocation9 + $0x17]] }
 0x3da   : > { %v1515_v59 = vmul.f32 %v1514_v47, %v2435_v31  ;;  %v880_v10 = vmul.f32 %v879_v48, %v2435_v31  ;;  %v806_v12 = vmul.f32 %v805_v54, %v2435_v31  ;;  %v1019_v14 = vmul.f32 %v1018_v49, %v2435_v31 }
 0x3db   : > { %v1084_v20 = vmul.f32 %v1083_v60, %v2435_v31  ;;  %v1362_v8 = vmul.f32 %v1361_v62, %v2435_v31  ;;  %v1220_v30 = vmul.f32 %v1219_v63, %v2512_v53  ;;  %v1498_v24 = vmul.f32 %v1497_v7, %v2512_v53 }
 0x3dc   : > { %v2540_v19 = vadd.f32 %v806_v12, %v803_v11  ;;  %v1501_v33 = vmul.f32 %v1500_v13, %v2435_v31  ;;  %v1277_v5 = vmul.f32 %v1276_v51, %v2435_v31  ;;  %v1415_v48 = vstv %s1868_s15  ;;  %s1835_s15 = sld [smem:[#allocation9 + $0x11]] }
 0x3dd   : > { %981 = vrot.lane.b32.xlu1 %v979_v34, %s3025_s11  ;;  %842 = vrot.lane.b32.xlu0 %v840_v35, %s3025_s11  ;;  %s2477_s11 = sld [smem:[#allocation9 + $0x33]]  ;;  %v2554_v1 = vadd.f32 %v1084_v20, %v1081_v18  ;;  %v2556_v32 = vadd.f32 %v1362_v8, %v1359_v27  ;;  %v1138_v35 = vmul.f32 %v1137_v50, %v2435_v31  ;;  %v1197_v54 = vstv %s1844_s10  ;;  %s1820_s10 = sld [smem:[#allocation9 + $0x10]] }
 0x3de   : > { %v2563_v36 = vadd.f32 %v1501_v33, %v1498_v24  ;;  %v1416_v50 = vmul.f32 %v1415_v48, %v2435_v31  ;;  %v1435_v61 = vstv %s1870_s7  ;;  %v1336_v62 = vstv %s1859_s13  ;;  %s1850_s7 = sld [smem:[#allocation9 + $0x12]]  ;;  %s1809_s13 = sld [smem:[#allocation9 + $0x1d]] }
 0x3df   : > { %v1436_v63 = vmul.f32 %v1435_v61, %v2435_v31  ;;  %v1058_v7 = vstv %s1829_s25  ;;  %s1878_s25 = sld [smem:[#allocation9 + $0xd]] }
 0x3e0   : > { %v1059_v11 = vmul.f32 %v1058_v7, %v2435_v31 }
 0x3e1   : > { %1239 = vrot.lane.b32.xlu1 %v1237_v37, %s3027_s9  ;;  %1100 = vrot.lane.b32.xlu0 %v1098_v6, %s3027_s9  ;;  %s2493_s9 = sld [smem:[#allocation9 + $0x35]]  ;;  %v1395_v37 = vstv %s2522_s23  ;;  %v1534_v6 = vstv %s2524_s26  ;;  %s2144_s23 = smov 32  }
 0x3e2   : > { %v1396_v38 = vmul.f32 %v1395_v37, %v2435_v31  ;;  %v1535_v39 = vmul.f32 %v1534_v6, %v2435_v31  ;;  %s1857_s26 = sld [smem:[#allocation9 + $0x58]] }
 0x3e3   : > { %v944_v56 = vstv %s2477_s11  ;;  %s1814_s11 = sld [smem:[#allocation9 + $0x5c]] }
 0x3e4   : > { %v945_v17 = vmul.f32 %v944_v56, %v2435_v31  ;;  %v1198_v56 = vmul.f32 %v1197_v54, %v2435_v31 }
 0x3e5   : > { %862 = vrot.lane.b32.xlu1 %v860_v40, %s2141_s27  ;;  %1001 = vrot.lane.b32.xlu0 %v999_v41, %s2141_s27  ;;  %v899_v40 = vstv %s2545_s0  ;;  %v1038_v41 = vstv %s1827_s1  ;;  %s1818_s0 = sld [smem:[#allocation9 + $0x9]]  ;;  %s1885_s1 = sld [smem:[#allocation9 + $0x53]] }
 0x3e6   : > { %v2547_v9 = vadd.f32 %v945_v17, %v942_v15  ;;  %v900_v42 = vmul.f32 %v899_v40, %v2435_v31  ;;  %v1039_v43 = vmul.f32 %v1038_v41, %v2435_v31 }
 0x3e7   : > { %v1222_v3 = vstv %s2493_s9  ;;  %s1883_s9 = sld [smem:[#allocation9 + $0x4c]] }
 0x3e8   : > { %v1223_v2 = vmul.f32 %v1222_v3, %v2435_v31  ;;  %v1337_v3 = vmul.f32 %v1336_v62, %v2435_v31  ;;  %v1316_v13 = vstv %s1857_s26  ;;  %s1824_s26 = sld [smem:[#allocation9 + $0x1e]] }
 0x3e9   : > { %1120 = vrot.lane.b32.xlu1 %v1118_v44, %s3059_s12  ;;  %1259 = vrot.lane.b32.xlu0 %v1257_v45, %s3059_s12  ;;  %v1157_v44 = vstv %s1840_s4  ;;  %v1296_v45 = vstv %s1855_s20  ;;  %s1807_s4 = sld [smem:[#allocation9 + $0x16]]  ;;  %s1805_s20 = sld [smem:[#allocation9 + $0xf]]  ;;  %v1317_v15 = vmul.f32 %v1316_v13, %v2435_v31 }
 0x3ea   : > { %v2559_v34 = vadd.f32 %v1223_v2, %v1220_v30  ;;  %v1158_v46 = vmul.f32 %v1157_v44, %v2435_v31  ;;  %v1297_v47 = vmul.f32 %v1296_v45, %v2435_v31  ;;  %v919_v52 = vstv %s1814_s11  ;;  %s1863_s11 = sld [smem:[#allocation9 + $0xc]] }
 0x3eb   : > { %v920_v55 = vmul.f32 %v919_v52, %v2435_v31  ;;  %v1574_v18 = vstv %s1885_s1  ;;  %v1108_v2 = vstv %s1835_s15  ;;  %s1852_s1 = sld [smem:[#allocation9 + $0x19]]  ;;  %s1839_s15 = sld [smem:[#allocation9 + $0x1f]] }
 0x3ec   : > { %v1575_v27 = vmul.f32 %v1574_v18, %v2435_v31  ;;  %v1109_v33 = vmul.f32 %v1108_v2, %v2512_v53 }
 0x3ed   : > { %1378 = vrot.lane.b32.xlu1 %v1376_v58, %s3060_s28  ;;  %1517 = vrot.lane.b32.xlu0 %v1515_v59, %s3060_s28  ;;  %v1554_v49 = vstv %s1883_s9  ;;  %v1455_v58 = vstv %s1872_s29  ;;  %v1178_v59 = vmul.f32 %v1177_v57, %v2435_v31  ;;  %s1833_s9 = sld [smem:[#allocation9 + $0xa]]  ;;  %s1848_s29 = sld [smem:[#allocation9 + $0xb]] }
 0x3ee   : > { %v1555_v51 = vmul.f32 %v1554_v49, %v2435_v31  ;;  %v1456_v60 = vmul.f32 %v1455_v58, %v2435_v31 }
 0x3ef   : > { %v850_v20 = vstv %s1807_s4  ;;  %v830_v30 = vstv %s1805_s20  ;;  %s1811_s4 = sld [smem:[#allocation9 + $0x24]] }
 0x3f0   : > { %v851_v8 = vmul.f32 %v850_v20, %v2512_v53  ;;  %v831_v24 = vmul.f32 %v830_v30, %v2512_v53  ;;  %s1880_s20 = sld [smem:[#allocation9 + $0x14]] }
 0x3f1   : > { %882 = vrot.lane.b32.xlu1 %v880_v10, %s2142_s2  ;;  %1021 = vrot.lane.b32.xlu0 %v1019_v14, %s2142_s2  ;;  %v810_v10 = vstv %s1803_s8  ;;  %v949_v14 = vstv %s1818_s0  ;;  %s1837_s8 = sld [smem:[#allocation9 + $0x18]]  ;;  %s1865_s0 = sld [smem:[#allocation9 + $0x13]] }
 0x3f2   : > { %v811_v12 = vmul.f32 %v810_v10, %v2512_v53  ;;  %v950_v17 = vmul.f32 %v949_v14, %v2512_v53 }
 0x3f5   : > { %1140 = vrot.lane.b32.xlu1 %v1138_v35, %s2141_s27  ;;  %1279 = vrot.lane.b32.xlu0 %v1277_v5, %s2141_s27  ;;  %v1088_v35 = vstv %s1833_s9  ;;  %v1366_v5 = vstv %s1863_s11  ;;  %s1826_s9 = sld [smem:[#allocation9 + $0x25]]  ;;  %s1867_s11 = sld [smem:[#allocation9 + $0x1a]] }
 0x3f6   : > { %v1089_v37 = vmul.f32 %v1088_v35, %v2512_v53  ;;  %v1367_v6 = vmul.f32 %v1366_v5, %v2512_v53 }
 0x3f9   : > { %1398 = vrot.lane.b32.xlu1 %v1396_v38, %s3059_s12  ;;  %1537 = vrot.lane.b32.xlu0 %v1535_v39, %s3059_s12  ;;  %v969_v38 = vstv %s1820_s10  ;;  %v989_v39 = vstv %s1822_s17  ;;  %s1854_s10 = sld [smem:[#allocation9 + $0x20]]  ;;  %s1813_s17 = sld [smem:[#allocation9 + $0x2b]] }
 0x3fa   : > { %v970_v40 = vmul.f32 %v969_v38, %v2512_v53  ;;  %v990_v41 = vmul.f32 %v989_v39, %v2512_v53 }
 0x3fd   : > { %902 = vrot.lane.b32.xlu1 %v900_v42, %s2143_s16  ;;  %1041 = vrot.lane.b32.xlu0 %v1039_v43, %s2143_s16  ;;  %v1227_v42 = vstv %s1848_s29  ;;  %v1247_v43 = vstv %s1850_s7  ;;  %s1882_s29 = sld [smem:[#allocation9 + $0x1b]]  ;;  %s1841_s7 = sld [smem:[#allocation9 + $0x26]] }
 0x3fe   : > { %v1228_v44 = vmul.f32 %v1227_v42, %v2512_v53  ;;  %v1248_v45 = vmul.f32 %v1247_v43, %v2512_v53 }
 0x401   : > { %1160 = vrot.lane.b32.xlu1 %v1158_v46, %s2142_s2  ;;  %1299 = vrot.lane.b32.xlu0 %v1297_v47, %s2142_s2  ;;  %v870_v46 = vstv %s1809_s13  ;;  %v1505_v47 = vstv %s1878_s25  ;;  %s1828_s13 = sld [smem:[#allocation9 + $0x2c]]  ;;  %s1869_s25 = sld [smem:[#allocation9 + $0x21]] }
 0x402   : > { %v871_v48 = vmul.f32 %v870_v46, %v2512_v53  ;;  %v1506_v49 = vmul.f32 %v1505_v47, %v2512_v53 }
 0x405   : > { %1418 = vrot.lane.b32.xlu1 %v1416_v50, %s2141_s27  ;;  %1557 = vrot.lane.b32.xlu0 %v1555_v51, %s2141_s27  ;;  %v1128_v50 = vstv %s1837_s8  ;;  %v1009_v51 = vstv %s1824_s26  ;;  %s1856_s8 = sld [smem:[#allocation9 + $0x27]]  ;;  %s1874_s26 = sld [smem:[#allocation9 + $0x60]] }
 0x406   : > { %v1129_v52 = vmul.f32 %v1128_v50, %v2512_v53  ;;  %v1010_v54 = vmul.f32 %v1009_v51, %v2512_v53 }
 0x407   : > { %v1426_v35 = vstv %s1869_s25  ;;  %s1790_s25 = sld [smem:[#allocation9 + $0xe]] }
 0x408   : > { %v1427_v38 = vmul.f32 %v1426_v35, %v2512_v53 }
 0x409   : > { %922 = vrot.lane.b32.xlu1 %v920_v55, %s2144_s23  ;;  %1200 = vrot.lane.b32.xlu0 %v1198_v56, %s2144_s23  ;;  %v1386_v55 = vstv %s1865_s0  ;;  %v1267_v56 = vstv %s1852_s1  ;;  %s1884_s0 = sld [smem:[#allocation9 + $0x22]]  ;;  %s1858_s1 = sld [smem:[#allocation9 + $0x2e]] }
 0x40a   : > { %v1387_v57 = vmul.f32 %v1386_v55, %v2512_v53  ;;  %v1268_v58 = vmul.f32 %v1267_v56, %v2512_v53 }
 0x40b   : > { %v1307_v5 = vstv %s1856_s8  ;;  %s1793_s8 = sld [smem:[#allocation9 + $0x46]] }
 0x40c   : > { %v1308_v39 = vmul.f32 %v1307_v5, %v2512_v53 }
 0x40d   : > { %1180 = vrot.lane.b32.xlu1 %v1178_v59, %s2143_s16  ;;  %1458 = vrot.lane.b32.xlu0 %v1456_v60, %s2143_s16  ;;  %v890_v59 = vstv %s1811_s4  ;;  %v1525_v60 = vstv %s1880_s20  ;;  %s1843_s4 = sld [smem:[#allocation9 + $0x2d]]  ;;  %s1886_s20 = sld [smem:[#allocation9 + $0x29]] }
 0x40e   : > { %v891_v61 = vmul.f32 %v890_v59, %v2512_v53  ;;  %v1526_v62 = vmul.f32 %v1525_v60, %v2512_v53 }
 0x40f   : > { %v1327_v46 = vstv %s1858_s1  ;;  %s1794_s1 = sld [smem:[#allocation9 + $0x1c]] }
 0x410   : > { %v1328_v50 = vmul.f32 %v1327_v46, %v2512_v53 }
 0x411   : > { %1438 = vrot.lane.b32.xlu1 %v1436_v63, %s2142_s2  ;;  %1339 = vrot.lane.b32.xlu0 %v1337_v3, %s2144_s23  ;;  %v1148_v63 = vstv %s1839_s15  ;;  %v1029_v3 = vstv %s1826_s9  ;;  %s1871_s15 = sld [smem:[#allocation9 + $0x28]]  ;;  %s1873_s9 = sld [smem:[#allocation9 + $0x2f]] }
 0x412   : > { %v1149_v7 = vmul.f32 %v1148_v63, %v2512_v53  ;;  %v1030_v10 = vmul.f32 %v1029_v3, %v2512_v53 }
 0x413   : > { %v1188_v47 = vstv %s1843_s4  ;;  %s1797_s4 = sld [smem:[#allocation9 + $0x54]] }
 0x414   : > { %v1189_v51 = vmul.f32 %v1188_v47, %v2512_v53 }
 0x415   : > { %1061 = vrot.lane.b32.xlu1 %v1059_v11, %s2144_s23  ;;  %813 = vrot.lane.b32.xlu0 %v811_v12, %s3060_s28  ;;  %v1406_v11 = vstv %s1867_s11  ;;  %v1287_v12 = vstv %s1854_s10  ;;  %s1887_s11 = sld [smem:[#allocation9 + $0x5a]]  ;;  %s1889_s10 = sld [smem:[#allocation9 + $0x61]] }
 0x416   : > { %v1407_v13 = vmul.f32 %v1406_v11, %v2512_v53  ;;  %v1288_v14 = vmul.f32 %v1287_v12, %v2512_v53 }
 0x417   : > { %v1466_v59 = vstv %s1873_s9  ;;  %s2150_s9 = smov 122  }
 0x418   : > { %v1467_v63 = vmul.f32 %v1466_v59, %v2512_v53 }
 0x419   : > { %1319 = vrot.lane.b32.xlu1 %v1317_v15, %s2143_s16  ;;  %952 = vrot.lane.b32.xlu0 %v950_v17, %s3060_s28  ;;  %v910_v15 = vstv %s1813_s17  ;;  %v1545_v17 = vstv %s1882_s29  ;;  %s1888_s17 = sld [smem:[#allocation9 + $0x30]] }
 0x41a   : > { %v911_v18 = vmul.f32 %v910_v15, %v2512_v53  ;;  %v1546_v20 = vmul.f32 %v1545_v17, %v2512_v53  ;;  %s1789_s29 = sld [smem:[#allocation9 + $0x38]]  ;;  %v767_v59 = vstv %s1797_s4 }
 0x41b   : > { %v1594_v60 = vstv %s1887_s11  ;;  %s659_s11 = sld [smem:[#allocation9]] }
 0x41c   : > { %v1595_v3 = vmul.f32 %v1594_v60, %v2435_v31 }
 0x41d   : > { %1577 = vrot.lane.b32.xlu1 %v1575_v27, %s2142_s2  ;;  %853 = vrot.lane.b32.xlu0 %v851_v8, %s2141_s27  ;;  %v1168_v27 = vstv %s1841_s7  ;;  %v1049_v8 = vstv %s1828_s13  ;;  %s1788_s7 = sld [smem:[#allocation9 + $0x7]] }
 0x41e   : > { %s1791_s13 = sld [smem:[#allocation9 + $0x3f]] }
 0x420   : > { %v683_v15 = vstv %s1789_s29  ;;  %s2151_s29 = smov [#allocation10]  }
 0x421   : > { %833 = vrot.lane.b32.xlu1 %v831_v24, %s3059_s12  ;;  %1111 = vrot.lane.b32.xlu0 %v1109_v33, %s3059_s12  ;;  %v1169_v24 = vmul.f32 %v1168_v27, %v2512_v53  ;;  %v1050_v33 = vmul.f32 %v1049_v8, %v2512_v53  ;;  %v684_v27 = vmul.f32 %v683_v15, %v2435_v31 }
 0x423   : > { %v672_v17 = vstv %s1788_s7  ;;  %s2062_s7 = sshll.u32 %s2151_s29, 4  ;;  %s2063_s7 = int_to_ptr.vmem [resolvable:$false] %s2062_s7 }
 0x424   : > { %v673_v8 = vmul.f32 %v672_v17, %v2512_v53 }
 0x425   : > { %1091 = vrot.lane.b32.xlu1 %v1089_v37, %s3060_s28  ;;  %1369 = vrot.lane.b32.xlu0 %v1367_v6, %s3060_s28 }
 0x429   : > { %972 = vrot.lane.b32.xlu1 %v970_v40, %s3059_s12  ;;  %992 = vrot.lane.b32.xlu0 %v990_v41, %s2141_s27  ;;  %v1475_v40 = vstv %s1874_s26  ;;  %v1565_v41 = vstv %s1884_s0  ;;  %s1792_s26 = sld [smem:[#allocation9 + $0x15]] }
 0x42a   : > { %s1795_s0 = sld [smem:[#allocation9 + $0x4d]] }
 0x42d   : > { %1230 = vrot.lane.b32.xlu1 %v1228_v44, %s3060_s28  ;;  %1250 = vrot.lane.b32.xlu0 %v1248_v45, %s3059_s12  ;;  %v1476_v44 = vmul.f32 %v1475_v40, %v2435_v31  ;;  %v1566_v45 = vmul.f32 %v1565_v41, %v2512_v53  ;;  %v725_v40 = vstv %s1793_s8 }
 0x42e   : > { %v726_v46 = vmul.f32 %v725_v40, %v2435_v31 }
 0x42f   : > { %v715_v41 = vstv %s1792_s26 }
 0x430   : > { %v716_v47 = vmul.f32 %v715_v41, %v2512_v53 }
 0x431   : > { %873 = vrot.lane.b32.xlu1 %v871_v48, %s2142_s2  ;;  %1508 = vrot.lane.b32.xlu0 %v1506_v49, %s3060_s28 }
 0x435   : > { %1131 = vrot.lane.b32.xlu1 %v1129_v52, %s2141_s27  ;;  %1012 = vrot.lane.b32.xlu0 %v1010_v54, %s2142_s2  ;;  %v1585_v52 = vstv %s1886_s20  ;;  %v1446_v54 = vstv %s1871_s15  ;;  %s1796_s20 = sld [smem:[#allocation9 + $0x23]]  ;;  %s1798_s15 = sld [smem:[#allocation9 + $0x2a]] }
 0x439   : > { %1389 = vrot.lane.b32.xlu1 %v1387_v57, %s3059_s12  ;;  %1270 = vrot.lane.b32.xlu0 %v1268_v58, %s2141_s27  ;;  %v1586_v57 = vmul.f32 %v1585_v52, %v2512_v53  ;;  %v1447_v58 = vmul.f32 %v1446_v54, %v2512_v53 }
 0x43b   : > { %v757_v60 = vstv %s1796_s20 }
 0x43d   : > { %893 = vrot.lane.b32.xlu1 %v891_v61, %s2143_s16  ;;  %1528 = vrot.lane.b32.xlu0 %v1526_v62, %s3059_s12 }
 0x441   : > { %1151 = vrot.lane.b32.xlu1 %v1149_v7, %s2142_s2  ;;  %1032 = vrot.lane.b32.xlu0 %v1030_v10, %s2143_s16  ;;  %v1614_v7 = vstv %s1889_s10  ;;  %v1605_v10 = vstv %s1888_s17  ;;  %s1787_s10 = sld [smem:[#allocation9 + $0x31]] }
 0x445   : > { %1409 = vrot.lane.b32.xlu1 %v1407_v13, %s2141_s27  ;;  %1290 = vrot.lane.b32.xlu0 %v1288_v14, %s2142_s2  ;;  %v1615_v13 = vmul.f32 %v1614_v7, %v2435_v31  ;;  %v1606_v14 = vmul.f32 %v1605_v10, %v2512_v53  ;;  %v768_v7 = vmul.f32 %v767_v59, %v2435_v31 }
 0x446   : > { %v758_v10 = vmul.f32 %v757_v60, %v2512_v53 }
 0x449   : > { %913 = vrot.lane.b32.xlu1 %v911_v18, %s2144_s23  ;;  %1548 = vrot.lane.b32.xlu0 %v1546_v20, %s2141_s27 }
 0x44b   : > { %v2654_v30 = vpop.permute.xlu1 %822  ;;  %v2656_v2 = vpop.permute.xlu0 %961 }
 0x44d   : > { %1171 = vrot.lane.b32.xlu1 %v1169_v24, %s2143_s16  ;;  %1052 = vrot.lane.b32.xlu0 %v1050_v33, %s2144_s23  ;;  %v704_v24 = vstv %s1791_s13  ;;  %v694_v33 = vstv %s1790_s25  ;;  %s2064_s13 = scalar_lea.vmem %s2063_s7, 2048 }
 0x44f   : > { %v2662_v37 = vpop.permute.xlu1 %981  ;;  %v2664_v6 = vpop.permute.xlu0 %842 }
 0x451   : > { %1429 = vrot.lane.b32.xlu1 %v1427_v38, %s2142_s2  ;;  %1310 = vrot.lane.b32.xlu0 %v1308_v39, %s2143_s16  ;;  %v705_v38 = vmul.f32 %v704_v24, %v2435_v31  ;;  %v695_v39 = vmul.f32 %v694_v33, %v2512_v53 }
 0x453   : > { %v2670_v42 = vpop.permute.xlu1 %1239  ;;  %v2672_v43 = vpop.permute.xlu0 %1100 }
 0x455   : > { %1478 = vrot.lane.b32.xlu1 %v1476_v44, %s2144_s23  ;;  %1568 = vrot.lane.b32.xlu0 %v1566_v45, %s2142_s2 }
 0x457   : > { %v2678_v48 = vpop.permute.xlu1 %862  ;;  %v2680_v49 = vpop.permute.xlu0 %1001 }
 0x459   : > { %1330 = vrot.lane.b32.xlu1 %v1328_v50, %s2144_s23  ;;  %1191 = vrot.lane.b32.xlu0 %v1189_v51, %s2144_s23  ;;  %v746_v50 = vstv %s1795_s0  ;;  %v736_v51 = vstv %s1794_s1 }
 0x45b   : > { %v2686_v55 = vpop.permute.xlu1 %1120  ;;  %v2688_v56 = vpop.permute.xlu0 %1259 }
 0x45d   : > { %1588 = vrot.lane.b32.xlu1 %v1586_v57, %s2143_s16  ;;  %1449 = vrot.lane.b32.xlu0 %v1447_v58, %s2143_s16  ;;  %v747_v57 = vmul.f32 %v746_v50, %v2435_v31  ;;  %v737_v58 = vmul.f32 %v736_v51, %v2512_v53 }
 0x45f   : > { %v2694_v61 = vpop.permute.xlu1 %1378  ;;  %v2696_v62 = vpop.permute.xlu0 %1517 }
 0x461   : > { %1469 = vrot.lane.b32.xlu1 %v1467_v63, %s2144_s23  ;;  %1597 = vrot.lane.b32.xlu0 %v1595_v3, %s2143_s16 }
 0x463   : > { %v2702_v11 = vpop.permute.xlu1 %882  ;;  %v2704_v12 = vpop.permute.xlu0 %1021 }
 0x465   : > { %1617 = vrot.lane.b32.xlu1 %v1615_v13, %s2144_s23  ;;  %1608 = vrot.lane.b32.xlu0 %v1606_v14, %s2144_s23  ;;  %v778_v14 = vstv %s1798_s15 }
 0x467   : > { %v2710_v18 = vpop.permute.xlu1 %1140  ;;  %v2712_v20 = vpop.permute.xlu0 %1279 }
 0x469   : > { %686 = vrot.lane.b32.xlu1 %v684_v27, %s3060_s28  ;;  %675 = vrot.lane.b32.xlu0 %v673_v8, %s3060_s28  ;;  %s1799_s28 = sld [smem:[#allocation9 + $0x5b]]  ;;  %v779_v8 = vmul.f32 %v778_v14, %v2512_v53 }
 0x46b   : > { %v2718_v35 = vpop.permute.xlu1 %1398  ;;  %v2720_v5 = vpop.permute.xlu0 %1537 }
 0x46d   : > { %707 = vrot.lane.b32.xlu1 %v705_v38, %s3059_s12  ;;  %697 = vrot.lane.b32.xlu0 %v695_v39, %s3059_s12  ;;  %s2146_s12 = smov 126  }
 0x46f   : > { %v2726_v44 = vpop.permute.xlu1 %902  ;;  %v2728_v45 = vpop.permute.xlu0 %1041  ;;  %v787_v13 = vstv %s1799_s28 }
 0x470   : > { %v788_v27 = vmul.f32 %v787_v13, %v2435_v31 }
 0x471   : > { %728 = vrot.lane.b32.xlu1 %v726_v46, %s2141_s27  ;;  %718 = vrot.lane.b32.xlu0 %v716_v47, %s2141_s27  ;;  %v824_v46 = vrot.slane %v2654_v30, 1  ;;  %s2145_s27 = smov 127  }
 0x473   : > { %v2734_v52 = vpop.permute.xlu1 %1160  ;;  %v2736_v54 = vpop.permute.xlu0 %1299 }
 0x475   : > { %749 = vrot.lane.b32.xlu1 %v747_v57, %s2142_s2  ;;  %739 = vrot.lane.b32.xlu0 %v737_v58, %s2142_s2  ;;  %v825_v57 = vsel %vm678_vm13, %v2654_v30, %v824_v46  ;;  %v963_v58 = vrot.slane %v2656_v2, 1  ;;  %s2147_s2 = smov 124  }
 0x477   : > { %v2742_v63 = vpop.permute.xlu1 %1418  ;;  %v2744_v3 = vpop.permute.xlu0 %1557 }
 0x479   : > { %770 = vrot.lane.b32.xlu1 %v768_v7, %s2143_s16  ;;  %760 = vrot.lane.b32.xlu0 %v758_v10, %s2143_s16  ;;  %s2148_s16 = smov 125  }
 0x47b   : > { %v2750_v15 = vpop.permute.xlu1 %922  ;;  %v2752_v17 = vpop.permute.xlu0 %1200 }
 0x47d   : > { %790 = vrot.lane.b32.xlu1 %v788_v27, %s2144_s23  ;;  %781 = vrot.lane.b32.xlu0 %v779_v8, %s2144_s23  ;;  %v844_v8 = vrot.slane %v2664_v6, 1  ;;  %s2149_s23 = smov 123  }
 0x47f   : > { %v2758_v24 = vpop.permute.xlu1 %1180  ;;  %v2760_v33 = vpop.permute.xlu0 %1458 }
 0x483   : > { %v2762_v38 = vpop.permute.xlu1 %1438  ;;  %v2764_v39 = vpop.permute.xlu0 %1339 }
 0x487   : > { %v2766_v40 = vpop.permute.xlu1 %1061  ;;  %v814_v41 = vpop.permute.xlu0 %813 }
 0x488   : > { %v815_v31 = vrot.slane %v814_v41, 1 }
 0x48a   : > { %v816_v53 = vsel %vm678_vm13, %v814_v41, %v815_v31 }
 0x48b   : > { %v818_v47 = vadd.f32 %v816_v53, %v2540_v19  ;;  %v2771_v50 = vpop.permute.xlu1 %1319  ;;  %v953_v51 = vpop.permute.xlu0 %952  ;;  %v964_v19 = vsel %vm678_vm13, %v2656_v2, %v963_v58  ;;  %v864_v2 = vrot.slane %v2678_v48, 1  ;;  %v1380_v58 = vrot.slane %v2694_v61, 1 }
 0x48c   : > { %v954_v59 = vrot.slane %v953_v51, 1 }
 0x48d   : > { %v827_v60 = vadd.f32 %v825_v57, %v818_v47  ;;  %v845_v47 = vsel %vm700_vm14, %v2664_v6, %v844_v8 }
 0x48e   : > { %v955_v7 = vsel %vm678_vm13, %v953_v51, %v954_v59 }
 0x48f   : > { %v957_v10 = vadd.f32 %v955_v7, %v2547_v9  ;;  %v2778_v13 = vpop.permute.xlu1 %1577  ;;  %v854_v14 = vpop.permute.xlu0 %853  ;;  %v1102_v9 = vrot.slane %v2672_v43, 1 }
 0x490   : > { %v855_v46 = vrot.slane %v854_v14, 1 }
 0x491   : > { %v966_v27 = vadd.f32 %v964_v19, %v957_v10  ;;  %v983_v19 = vrot.slane %v2662_v37, 1 }
 0x493   : > { %v834_v41 = vpop.permute.xlu1 %833  ;;  %v1112_v31 = vpop.permute.xlu0 %1111 }
 0x494   : > { %v835_v30 = vrot.slane %v834_v41, 1 }
 0x496   : > { %v836_v53 = vsel %vm700_vm14, %v834_v41, %v835_v30  ;;  %v856_v41 = vsel %vm721_vm15, %v854_v14, %v855_v46  ;;  %v1113_v30 = vrot.slane %v1112_v31, 1  ;;  %v1122_v14 = vrot.slane %v2686_v55, 1 }
 0x497   : > { %v838_v51 = vadd.f32 %v836_v53, %v827_v60  ;;  %v1092_v57 = vpop.permute.xlu1 %1091  ;;  %v1370_v59 = vpop.permute.xlu0 %1369  ;;  %v1103_v60 = vsel %vm678_vm13, %v2672_v43, %v1102_v9  ;;  %v1381_v46 = vsel %vm678_vm13, %v2694_v61, %v1380_v58  ;;  %v1003_v61 = vrot.slane %v2680_v49, 1 }
 0x498   : > { %v1093_v7 = vrot.slane %v1092_v57, 1  ;;  %v1371_v10 = vrot.slane %v1370_v59, 1 }
 0x499   : > { %v847_v16 = vadd.f32 %v845_v47, %v838_v51  ;;  %v865_v47 = vsel %vm721_vm15, %v2678_v48, %v864_v2 }
 0x49a   : > { %v1094_v6 = vsel %vm678_vm13, %v1092_v57, %v1093_v7  ;;  %v1372_v8 = vsel %vm678_vm13, %v1370_v59, %v1371_v10 }
 0x49b   : > { %v1096_v53 = vadd.f32 %v1094_v6, %v2554_v1  ;;  %v1374_v0 = vadd.f32 %v1372_v8, %v2556_v32  ;;  %v973_v4 = vpop.permute.xlu1 %972  ;;  %v993_v23 = vpop.permute.xlu0 %992  ;;  %v858_v28 = vadd.f32 %v856_v41, %v847_v16  ;;  %v1114_v1 = vsel %vm700_vm14, %v1112_v31, %v1113_v30 }
 0x49c   : > { %v974_v51 = vrot.slane %v973_v4, 1  ;;  %v994_v43 = vrot.slane %v993_v23, 1  ;;  %v1241_v16 = vrot.slane %v2670_v42, 1  ;;  %v984_v41 = vsel %vm700_vm14, %v2662_v37, %v983_v19 }
 0x49d   : > { %v1105_v57 = vadd.f32 %v1103_v60, %v1096_v53  ;;  %v867_v59 = vadd.f32 %v865_v47, %v858_v28  ;;  %v2802_v7 = vadd.f32 %v1381_v46, %v1374_v0  ;;  %v1123_v28 = vsel %vm700_vm14, %v2686_v55, %v1122_v14 }
 0x49e   : > { %v975_v32 = vsel %vm700_vm14, %v973_v4, %v974_v51  ;;  %v1261_v31 = vrot.slane %v2688_v56, 1  ;;  %v1519_v30 = vrot.slane %v2696_v62, 1  ;;  %v1242_v37 = vsel %vm678_vm13, %v2670_v42, %v1241_v16 }
 0x49f   : > { %v977_v9 = vadd.f32 %v975_v32, %v966_v27  ;;  %v1231_v10 = vpop.permute.xlu1 %1230  ;;  %v1251_v48 = vpop.permute.xlu0 %1250  ;;  %v1116_v2 = vadd.f32 %v1114_v1, %v1105_v57  ;;  %v995_v27 = vsel %vm721_vm15, %v993_v23, %v994_v43  ;;  %v1004_v47 = vsel %vm721_vm15, %v2680_v49, %v1003_v61 }
 0x4a0   : > { %v1232_v0 = vrot.slane %v1231_v10, 1  ;;  %v1252_v8 = vrot.slane %v1251_v48, 1  ;;  %v884_v14 = vrot.slane %v2702_v11, 1  ;;  %v1262_v23 = vsel %vm700_vm14, %v2688_v56, %v1261_v31 }
 0x4a1   : > { %v986_v58 = vadd.f32 %v984_v41, %v977_v9  ;;  %v1125_v4 = vadd.f32 %v1123_v28, %v1116_v2  ;;  %v1520_v42 = vsel %vm678_vm13, %v2696_v62, %v1519_v30  ;;  %v1023_v49 = vrot.slane %v2704_v12, 1 }
 0x4a2   : > { %v1233_v6 = vsel %vm678_vm13, %v1231_v10, %v1232_v0  ;;  %v885_v41 = vsel %vm742_vm0, %v2702_v11, %v884_v14  ;;  %v1142_v61 = vrot.slane %v2710_v18, 1 }
 0x4a3   : > { %v997_v19 = vadd.f32 %v995_v27, %v986_v58  ;;  %v1235_v60 = vadd.f32 %v1233_v6, %v2559_v34  ;;  %v874_v53 = vpop.permute.xlu1 %873  ;;  %v1509_v55 = vpop.permute.xlu0 %1508  ;;  %v1253_v34 = vsel %vm700_vm14, %v1251_v48, %v1252_v8 }
 0x4a4   : > { %v875_v46 = vrot.slane %v874_v53, 1  ;;  %v1510_v51 = vrot.slane %v1509_v55, 1 }
 0x4a5   : > { %v1244_v57 = vadd.f32 %v1242_v37, %v1235_v60  ;;  %v1006_v1 = vadd.f32 %v1004_v47, %v997_v19  ;;  %v1143_v37 = vsel %vm721_vm15, %v2710_v18, %v1142_v61  ;;  %v1400_v19 = vrot.slane %v2718_v35, 1 }
 0x4a6   : > { %v876_v32 = vsel %vm742_vm0, %v874_v53, %v875_v46  ;;  %v1511_v43 = vsel %vm678_vm13, %v1509_v55, %v1510_v51  ;;  %v1162_v61 = vrot.slane %v2734_v52, 1 }
 0x4a7   : > { %v1255_v16 = vadd.f32 %v1253_v34, %v1244_v57  ;;  %v878_v9 = vadd.f32 %v876_v32, %v867_v59  ;;  %v1513_v10 = vadd.f32 %v1511_v43, %v2563_v36  ;;  %v1132_v2 = vpop.permute.xlu1 %1131  ;;  %v1013_v56 = vpop.permute.xlu0 %1012  ;;  %v1024_v59 = vsel %vm742_vm0, %v2704_v12, %v1023_v49 }
 0x4a8   : > { %v1133_v62 = vrot.slane %v1132_v2, 1  ;;  %v1014_v28 = vrot.slane %v1013_v56, 1  ;;  %v1281_v36 = vrot.slane %v2712_v20, 1 }
 0x4a9   : > { %v1264_v48 = vadd.f32 %v1262_v23, %v1255_v16  ;;  %v887_v0 = vadd.f32 %v885_v41, %v878_v9  ;;  %v1522_v31 = vadd.f32 %v1520_v42, %v1513_v10  ;;  %v904_v42 = vrot.slane %v2726_v44, 1 }
 0x4aa   : > { %v1134_v58 = vsel %vm721_vm15, %v1132_v2, %v1133_v62  ;;  %v1015_v30 = vsel %vm742_vm0, %v1013_v56, %v1014_v28  ;;  %v1282_v12 = vsel %vm721_vm15, %v2712_v20, %v1281_v36  ;;  %v1043_v9 = vrot.slane %v2728_v45, 1 }
 0x4ab   : > { %v1136_v27 = vadd.f32 %v1134_v58, %v1125_v4  ;;  %v1017_v6 = vadd.f32 %v1015_v30, %v1006_v1  ;;  %v1390_v8 = vpop.permute.xlu1 %1389  ;;  %v1271_v11 = vpop.permute.xlu0 %1270  ;;  %v1539_v4 = vrot.slane %v2720_v5, 1  ;;  %v1401_v1 = vsel %vm700_vm14, %v2718_v35, %v1400_v19 }
 0x4ac   : > { %v1391_v60 = vrot.slane %v1390_v8, 1  ;;  %v1272_v53 = vrot.slane %v1271_v11, 1  ;;  %v905_v41 = vsel %vm763_vm1, %v2726_v44, %v904_v42  ;;  %v1163_v44 = vsel %vm742_vm0, %v2734_v52, %v1162_v61 }
 0x4ad   : > { %v1145_v55 = vadd.f32 %v1143_v37, %v1136_v27  ;;  %v1026_v47 = vadd.f32 %v1024_v59, %v1017_v6  ;;  %v1440_v61 = vrot.slane %v2762_v38, 1 }
 0x4ae   : > { %v1392_v14 = vsel %vm700_vm14, %v1390_v8, %v1391_v60  ;;  %v1273_v46 = vsel %vm721_vm15, %v1271_v11, %v1272_v53  ;;  %v1420_v8 = vrot.slane %v2742_v63, 1 }
 0x4af   : > { %v1394_v51 = vadd.f32 %v1392_v14, %v2802_v7  ;;  %v1275_v23 = vadd.f32 %v1273_v46, %v1264_v48  ;;  %v894_v57 = vpop.permute.xlu1 %893  ;;  %v1529_v18 = vpop.permute.xlu0 %1528  ;;  %v1540_v7 = vsel %vm700_vm14, %v2720_v5, %v1539_v4  ;;  %v1044_v5 = vsel %vm763_vm1, %v2728_v45, %v1043_v9 }
 0x4b0   : > { %v895_v34 = vrot.slane %v894_v57, 1  ;;  %v1530_v32 = vrot.slane %v1529_v18, 1  ;;  %v1421_v52 = vsel %vm721_vm15, %v2742_v63, %v1420_v8 }
 0x4b1   : > { %v1403_v43 = vadd.f32 %v1401_v1, %v1394_v51  ;;  %v1284_v49 = vadd.f32 %v1282_v12, %v1275_v23  ;;  %v924_v51 = vrot.slane %v2750_v15, 1 }
 0x4b2   : > { %v896_v16 = vsel %vm763_vm1, %v894_v57, %v895_v34  ;;  %v1531_v20 = vsel %vm700_vm14, %v1529_v18, %v1530_v32  ;;  %v1182_v32 = vrot.slane %v2758_v24, 1 }
 0x4b3   : > { %v898_v10 = vadd.f32 %v896_v16, %v887_v0  ;;  %v1533_v2 = vadd.f32 %v1531_v20, %v1522_v31  ;;  %v1152_v56 = vpop.permute.xlu1 %1151  ;;  %v1033_v35 = vpop.permute.xlu0 %1032  ;;  %v1301_v0 = vrot.slane %v2736_v54, 1  ;;  %v925_v63 = vsel %vm357_vm5, %v2750_v15, %v924_v51 }
 0x4b4   : > { %v1153_v62 = vrot.slane %v1152_v56, 1  ;;  %v1034_v28 = vrot.slane %v1033_v35, 1 }
 0x4b5   : > { %v907_v48 = vadd.f32 %v905_v41, %v898_v10  ;;  %v1542_v58 = vadd.f32 %v1540_v7, %v1533_v2  ;;  %v1302_v45 = vsel %vm742_vm0, %v2736_v54, %v1301_v0  ;;  %v1063_v7 = vrot.slane %v2766_v40, 1 }
 0x4b6   : > { %v1154_v30 = vsel %vm742_vm0, %v1152_v56, %v1153_v62  ;;  %v1035_v59 = vsel %vm763_vm1, %v1033_v35, %v1034_v28 }
 0x4b7   : > { %v1156_v31 = vadd.f32 %v1154_v30, %v1145_v55  ;;  %v1037_v36 = vadd.f32 %v1035_v59, %v1026_v47  ;;  %v1410_v27 = vpop.permute.xlu1 %1409  ;;  %v1291_v6 = vpop.permute.xlu0 %1290  ;;  %v1559_v55 = vrot.slane %v2744_v3, 1  ;;  %v1321_v30 = vrot.slane %v2771_v50, 1 }
 0x4b8   : > { %v1411_v11 = vrot.slane %v1410_v27, 1  ;;  %v1292_v37 = vrot.slane %v1291_v6, 1 }
 0x4b9   : > { %v1165_v19 = vadd.f32 %v1163_v44, %v1156_v31  ;;  %v1046_v60 = vadd.f32 %v1044_v5, %v1037_v36  ;;  %v1560_v54 = vsel %vm721_vm15, %v2744_v3, %v1559_v55  ;;  %v1183_v3 = vsel %vm763_vm1, %v2758_v24, %v1182_v32 }
 0x4ba   : > { %v1412_v53 = vsel %vm721_vm15, %v1410_v27, %v1411_v11  ;;  %v1293_v14 = vsel %vm742_vm0, %v1291_v6, %v1292_v37  ;;  %v1441_v11 = vsel %vm742_vm0, %v2762_v38, %v1440_v61  ;;  %v1579_v37 = vrot.slane %v2778_v13, 1 }
 0x4bb   : > { %v1414_v47 = vadd.f32 %v1412_v53, %v1403_v43  ;;  %v1295_v46 = vadd.f32 %v1293_v14, %v1284_v49  ;;  %v914_v12 = vpop.permute.xlu1 %913  ;;  %v1549_v4 = vpop.permute.xlu0 %1548 }
 0x4bc   : > { %v915_v23 = vrot.slane %v914_v12, 1  ;;  %v1550_v57 = vrot.slane %v1549_v4, 1  ;;  %v1580_v38 = vsel %vm742_vm0, %v2778_v13, %v1579_v37 }
 0x4bd   : > { %v1423_v18 = vadd.f32 %v1421_v52, %v1414_v47  ;;  %v1304_v1 = vadd.f32 %v1302_v45, %v1295_v46  ;;  %v1202_v45 = vrot.slane %v2752_v17, 1 }
 0x4be   : > { %v916_v42 = vsel %vm357_vm5, %v914_v12, %v915_v23  ;;  %v1551_v34 = vsel %vm721_vm15, %v1549_v4, %v1550_v57  ;;  %v1341_v12 = vrot.slane %v2764_v39, 1  ;;  %v1460_v57 = vrot.slane %v2760_v33, 1 }
 0x4bf   : > { %v918_v43 = vadd.f32 %v916_v42, %v907_v48  ;;  %v1553_v49 = vadd.f32 %v1551_v34, %v1542_v58  ;;  %v1172_v16 = vpop.permute.xlu1 %1171  ;;  %v1053_v20 = vpop.permute.xlu0 %1052  ;;  %v1064_v58 = vsel %vm357_vm5, %v2766_v40, %v1063_v7  ;;  %v1322_v40 = vsel %vm763_vm1, %v2771_v50, %v1321_v30 }
 0x4c0   : > { %v1173_v9 = vrot.slane %v1172_v16, 1  ;;  %v1054_v10 = vrot.slane %v1053_v20, 1  ;;  %v1342_v32 = vsel %vm357_vm5, %v2764_v39, %v1341_v12 }
 0x4c1   : > { %v927_v2 = vadd.f32 %v925_v63, %v918_v43  ;;  %v1562_v56 = vadd.f32 %v1560_v54, %v1553_v49  ;;  %v1203_v54 = vsel %vm357_vm5, %v2752_v17, %v1202_v45  ;;  %v1461_v63 = vsel %vm763_vm1, %v2760_v33, %v1460_v57 }
 0x4c2   : > { %v1174_v35 = vsel %vm763_vm1, %v1172_v16, %v1173_v9  ;;  %v1055_v41 = vsel %vm357_vm5, %v1053_v20, %v1054_v10 }
 0x4c3   : > { %v1176_v62 = vadd.f32 %v1174_v35, %v1165_v19  ;;  %v1057_v28 = vadd.f32 %v1055_v41, %v1046_v60  ;;  %v1430_v48 = vpop.permute.xlu1 %1429  ;;  %929 = vrot.lane.b32.xlu0 %v927_v2, %s2145_s27  ;;  %v1311_v15 = vpop.permute.xlu0 %1310 }
 0x4c4   : > { %v1431_v59 = vrot.slane %v1430_v48, 1  ;;  %v1312_v5 = vrot.slane %v1311_v15, 1 }
 0x4c5   : > { %v1066_v0 = vadd.f32 %v1064_v58, %v1057_v28  ;;  %v1185_v31 = vadd.f32 %v1183_v3, %v1176_v62 }
 0x4c6   : > { %v1432_v36 = vsel %vm742_vm0, %v1430_v48, %v1431_v59  ;;  %v1313_v24 = vsel %vm763_vm1, %v1311_v15, %v1312_v5 }
 0x4c7   : > { %v1434_v27 = vadd.f32 %v1432_v36, %v1423_v18  ;;  %v1315_v6 = vadd.f32 %v1313_v24, %v1304_v1  ;;  %v1479_v44 = vpop.permute.xlu1 %1478  ;;  %1068 = vrot.lane.b32.xlu1 %v1066_v0, %s2146_s12  ;;  %v1569_v8 = vpop.permute.xlu0 %1568  ;;  %s1897_s12 = sshll.u32 %s2205_s22, 10 }
 0x4c8   : > { %v1570_v19 = vrot.slane %v1569_v8, 1  ;;  %v1480_v17 = vrot.slane %v1479_v44, 1  ;;  %s2965_s22 = scalar_lea.hbm %s3020_s5, %s1897_s12 }
 0x4c9   : > { %v1324_v60 = vadd.f32 %v1322_v40, %v1315_v6  ;;  %v1443_v53 = vadd.f32 %v1441_v11, %v1434_v27  ;;  %v661_v27 = vld [vmem:[#allocation3] sm:$0x3]  ;;  %v662_v6 = vstv %s659_s11 }
 0x4ca   : > { %v1571_v14 = vsel %vm742_vm0, %v1569_v8, %v1570_v19  ;;  %v1481_v48 = vsel %vm357_vm5, %v1479_v44, %v1480_v17  ;;  %v665_v44 = vld [vmem:[#allocation4] sm:$0x3]  ;;  %v666_v8 = vstv %s1787_s10  ;;  %v663_v40 = vmul.f32 %v662_v6, %v661_v27  ;;  %v658_v6 = vld [vmem:[%s3018_s3] ss:$8 sm:$0x3]  ;;  %s1674_s10 = scalar_lea.sflag [#allocation7], %s2311_s14 }
 0x4cb   : > { %v1573_v55 = vadd.f32 %v1571_v14, %v1562_v56  ;;  %v1331_v47 = vpop.permute.xlu1 %1330  ;;  %v1192_v46 = vpop.permute.xlu0 %1191  ;;  %v667_v37 = vmul.f32 %v666_v8, %v665_v44  ;;  %v1815_v8 = vld [vmem:[%s3018_s3 + $0x2] ss:$8 sm:$0x3] }
 0x4cc   : > { %v1332_v4 = vrot.slane %v1331_v47, 1  ;;  %v1193_v52 = vrot.slane %v1192_v46, 1 }
 0x4cd   : > { %v1582_v50 = vadd.f32 %v1580_v38, %v1573_v55 }
 0x4ce   : > { %v1333_v51 = vsel %vm357_vm5, %v1331_v47, %v1332_v4  ;;  %v1194_v23 = vsel %vm357_vm5, %v1192_v46, %v1193_v52 }
 0x4cf   : > { %v1335_v18 = vadd.f32 %v1333_v51, %v1324_v60  ;;  %v1196_v1 = vadd.f32 %v1194_v23, %v1185_v31  ;;  %v1589_v42 = vpop.permute.xlu1 %1588  ;;  %v1450_v34 = vpop.permute.xlu0 %1449 }
 0x4d0   : > { %v1590_v13 = vrot.slane %v1589_v42, 1  ;;  %v1451_v43 = vrot.slane %v1450_v34, 1 }
 0x4d1   : > { %v1344_v49 = vadd.f32 %v1342_v32, %v1335_v18  ;;  %v1205_v16 = vadd.f32 %v1203_v54, %v1196_v1 }
 0x4d2   : > { %v1452_v20 = vsel %vm763_vm1, %v1450_v34, %v1451_v43  ;;  %v1591_v2 = vsel %vm763_vm1, %v1589_v42, %v1590_v13 }
 0x4d3   : > { %v1454_v7 = vadd.f32 %v1452_v20, %v1443_v53  ;;  %v1470_v9 = vpop.permute.xlu1 %1469  ;;  %1346 = vrot.lane.b32.xlu1 %v1344_v49, %s2147_s2  ;;  %1207 = vrot.lane.b32.xlu0 %v1205_v16, %s2148_s16  ;;  %v1598_v10 = vpop.permute.xlu0 %1597  ;;  %v1593_v61 = vadd.f32 %v1591_v2, %v1582_v50  ;;  %v668_v53 = vadd.f32 %v667_v37, %v663_v40  ;;  %s3061_s2 = sshll.u32 %s2311_s14, 6 }
 0x4d4   : > { %v1471_v39 = vrot.slane %v1470_v9, 1  ;;  %v1599_v56 = vrot.slane %v1598_v10, 1  ;;  %s256_s16 = scalar_lea.vmem [#allocation10], %s3061_s2 }
 0x4d5   : > { %v1463_v35 = vadd.f32 %v1461_v63, %v1454_v7 }
 0x4d6   : > { %v1472_v41 = vsel %vm357_vm5, %v1470_v9, %v1471_v39  ;;  %v1600_v3 = vsel %vm763_vm1, %v1598_v10, %v1599_v56 }
 0x4d7   : > { %v1474_v62 = vadd.f32 %v1472_v41, %v1463_v35  ;;  %v1618_v33 = vpop.permute.xlu1 %1617  ;;  %v1609_v28 = vpop.permute.xlu0 %1608  ;;  %v1602_v59 = vadd.f32 %v1600_v3, %v1593_v61 }
 0x4d8   : > { %v1619_v15 = vrot.slane %v1618_v33, 1  ;;  %v1610_v58 = vrot.slane %v1609_v28, 1 }
 0x4d9   : > { %v1483_v30 = vadd.f32 %v1481_v48, %v1474_v62 }
 0x4da   : > { %v1611_v5 = vsel %vm357_vm5, %v1609_v28, %v1610_v58  ;;  %v1620_v31 = vsel %vm357_vm5, %v1618_v33, %v1619_v15 }
 0x4db   : > { %v1613_v0 = vadd.f32 %v1611_v5, %v1602_v59  ;;  %1485 = vrot.lane.b32.xlu0 %v1483_v30, %s2149_s23  ;;  %v676_v24 = vpop.permute.xlu0 %675  ;;  %v687_v19 = vpop.permute.xlu1 %686  ;;  %s1687_s23 = sshll.u32 %s256_s16, 4  ;;  %s2967_s23 = int_to_ptr.vmem [resolvable:$true] %s1687_s23 }
 0x4dc   : > { %v677_v11 = vrot.slane %v676_v24, 1  ;;  %v688_v45 = vrot.slane %v687_v19, 1  ;;  %s2058_s17 = scalar_lea.vmem %s2967_s23, 1024  ;;  %p2065_p10 = scmp.lt.s32.totalorder %s2967_s23, %s2063_s7 }
 0x4dd   : > { %v1622_v36 = vadd.f32 %v1620_v31, %v1613_v0  ;;  %p2059_p5 = scmp.ne.s32.totalorder %s2967_s23, %s2058_s17  ;;  %p2066_p1 = scmp.lt.s32.totalorder %s2064_s13, %s2058_s17 }
 0x4de   : > { %v679_v60 = vsel %vm678_vm13, %v676_v24, %v677_v11  ;;  %v689_v46 = vsel %vm678_vm13, %v687_v19, %v688_v45 }
 0x4df   : > { %1624 = vrot.lane.b32.xlu1 %v1622_v36, %s2150_s9  ;;  %v698_v14 = vpop.permute.xlu0 %697  ;;  %v681_v55 = vadd.f32 %v679_v60, %v668_v53  ;;  %v708_v12 = vpop.permute.xlu1 %707  ;;  %v1800_v36 = vld [vmem:[%s3018_s3 + $0x1] ss:$8 sm:$0x3]  ;;  %v1830_v60 = vld [vmem:[%s3018_s3 + $0x3] ss:$8 sm:$0x3]  ;;  %p2060_p8 = pnand %p2059_p5, %p3067_p12  ;;  %p2067_p4 = por %p2066_p1, %p2065_p10 }
 0x4e0   : > { %v699_v47 = vrot.slane %v698_v14, 1  ;;  %v709_v50 = vrot.slane %v708_v12, 1 }
 0x4e1   : > { %v691_v38 = vadd.f32 %v689_v46, %v681_v55  ;;  %p2061_p9 = pneg %p2060_p8 }
 0x4e2   : > { %v701_v4 = vsel %vm700_vm14, %v698_v14, %v699_v47  ;;  %v710_v57 = vsel %vm700_vm14, %v708_v12, %v709_v50  ;;  %v1860_v50 = vld [vmem:[%s3018_s3 + $0x5] ss:$8 sm:$0x3] }
 0x4e3   : > { %v719_v52 = vpop.permute.xlu0 %718  ;;  %v703_v51 = vadd.f32 %v701_v4, %v691_v38  ;;  %v729_v18 = vpop.permute.xlu1 %728  ;;  %v1845_v38 = vld [vmem:[%s3018_s3 + $0x4] ss:$8 sm:$0x3]  ;;  %p2068_p11 = pnand %p2067_p4, %p2061_p9 }
 0x4e4   : > { %v720_v23 = vrot.slane %v719_v52, 1  ;;  %v730_v54 = vrot.slane %v729_v18, 1 }
 0x4e5   : > { %v712_v1 = vadd.f32 %v710_v57, %v703_v51 }
 0x4e6   : > { %v722_v42 = vsel %vm721_vm15, %v719_v52, %v720_v23  ;;  %v731_v43 = vsel %vm721_vm15, %v729_v18, %v730_v54 }
 0x4e7   : > { %v740_v34 = vpop.permute.xlu0 %739  ;;  %v724_v32 = vadd.f32 %v722_v42, %v712_v1  ;;  %v750_v49 = vpop.permute.xlu1 %749 }
 0x4e8   : > { %v741_v13 = vrot.slane %v740_v34, 1  ;;  %v751_v7 = vrot.slane %v750_v49, 1 }
 0x4e9   : > { %v733_v16 = vadd.f32 %v731_v43, %v724_v32 }
 0x4ea   : > { %v743_v20 = vsel %vm742_vm0, %v740_v34, %v741_v13  ;;  %v752_v17 = vsel %vm742_vm0, %v750_v49, %v751_v7  ;;  %v1875_v34 = vld [vmem:[%s3018_s3 + $0x6] ss:$8 sm:$0x3] }
 0x4eb   : > { %v761_v63 = vpop.permute.xlu0 %760  ;;  %v745_v9 = vadd.f32 %v743_v20, %v733_v16  ;;  %v771_v2 = vpop.permute.xlu1 %770 }
 0x4ec   : > { %v762_v10 = vrot.slane %v761_v63, 1  ;;  %v772_v41 = vrot.slane %v771_v2, 1 }
 0x4ed   : > { %v754_v39 = vadd.f32 %v752_v17, %v745_v9  ;;  %v1653_v9 = vsub.s32 1, %v2374_v29  ;;  %v3062_v17 = vsub.s32 0, %v2374_v29 }
 0x4ee   : > { %v764_v56 = vsel %vm763_vm1, %v761_v63, %v762_v10  ;;  %v773_v33 = vsel %vm763_vm1, %v771_v2, %v772_v41 }
 0x4ef   : > { %v782_v35 = vpop.permute.xlu0 %781  ;;  %v766_v3 = vadd.f32 %v764_v56, %v754_v39  ;;  %v791_v62 = vpop.permute.xlu1 %790 }
 0x4f0   : > { %v783_v61 = vrot.slane %v782_v35, 1  ;;  %v792_v30 = vrot.slane %v791_v62, 1 }
 0x4f1   : > { %v775_v28 = vadd.f32 %v773_v33, %v766_v3 }
 0x4f2   : > { %v784_v15 = vsel %vm357_vm5, %v782_v35, %v783_v61  ;;  %v793_v31 = vsel %vm357_vm5, %v791_v62, %v792_v30  ;;  %vm1349_vm5 = vcmask 1014784   ;;  %v3063_v61 = vld [vmem:[#allocation16_spill] sm:$0xff] }
 0x4f3   : > { %v786_v5 = vadd.f32 %v784_v15, %v775_v28 }
 0x4f5   : > { %v795_v27 = vadd.f32 %v793_v31, %v786_v5 }
 0x4f7   : > { %v796_v14 = vmul.f32 %v795_v27, %v658_v6 }
 0x535   : > { %v930_v48 = vpop.permute.xlu0 %929 }
 0x536   : > { %v931_v59 = vrot.slane %v930_v48, 1 }
 0x538   : > { %v933_v24 = vsel %vm932_vm2, %v930_v48, %v931_v59 }
 0x539   : > { %v1069_v58 = vpop.permute.xlu1 %1068  ;;  %v935_v37 = vmul.f32 %v1800_v36, %v933_v24 }
 0x53a   : > { %v1070_v0 = vrot.slane %v1069_v58, 1 }
 0x53b   : > { %v936_v47 = vadd.f32 %v935_v37, %v796_v14 }
 0x53c   : > { %v1072_v11 = vsel %vm1071_vm3, %v1069_v58, %v1070_v0 }
 0x53d   : > { %v1074_v45 = vmul.f32 %v1815_v8, %v1072_v11 }
 0x53f   : > { %v1075_v12 = vadd.f32 %v1074_v45, %v936_v47 }
 0x545   : > { %v1208_v44 = vpop.permute.xlu0 %1207  ;;  %v1347_v19 = vpop.permute.xlu1 %1346 }
 0x546   : > { %v1209_v40 = vrot.slane %v1208_v44, 1  ;;  %v1348_v55 = vrot.slane %v1347_v19, 1 }
 0x548   : > { %v1211_v53 = vsel %vm1210_vm4, %v1208_v44, %v1209_v40  ;;  %v1350_v52 = vsel %vm1349_vm5, %v1347_v19, %v1348_v55 }
 0x549   : > { %v1213_v46 = vmul.f32 %v1830_v60, %v1211_v53  ;;  %v1352_v18 = vmul.f32 %v1845_v38, %v1350_v52 }
 0x54b   : > { %v1214_v23 = vadd.f32 %v1213_v46, %v1075_v12 }
 0x54d   : > { %v1486_v4 = vpop.permute.xlu0 %1485  ;;  %v1353_v32 = vadd.f32 %v1352_v18, %v1214_v23 }
 0x54e   : > { %v1487_v51 = vrot.slane %v1486_v4, 1 }
 0x550   : > { %v1489_v57 = vsel %vm1488_vm6, %v1486_v4, %v1487_v51 }
 0x551   : > { %v1491_v1 = vmul.f32 %v1860_v50, %v1489_v57  ;;  %v1625_v42 = vpop.permute.xlu1 %1624 }
 0x552   : > { %v1626_v54 = vrot.slane %v1625_v42, 1 }
 0x553   : > { %v1492_v43 = vadd.f32 %v1491_v1, %v1353_v32 }
 0x554   : > { %v1628_v13 = vsel %vm1627_vm7, %v1625_v42, %v1626_v54 }
 0x555   : > { %v1630_v49 = vmul.f32 %v1875_v34, %v1628_v13 }
 0x557   : > { %v1631_v16 = vadd.f32 %v1630_v49, %v1492_v43 }
 0x559   : > { %v1890_v20 = vmul.f32 -1.442695, %v1631_v16 }
 0x55b   : > { %2009 = vpow2.f32 %v1890_v20 }
 0x565   : > { %v2010_v63 = vpop.eup %2009 }
 0x566   : > { %v1635_v7 = vadd.f32 1.0, %v2010_v63 }
 0x568   : > { %2011 = vrcp.f32 %v1635_v7 }
 0x572   : > { %v2012_v10 = vpop.eup %2011 }
 0x573   : > { %v1650_v2 = vrot.slane %v2012_v10, %v3062_v17  ;;  %v1654_v39 = vrot.slane %v2012_v10, %v1653_v9 }
 0x575   : > { %v1657_v56 = vmul.f32 %v1650_v2, %v2399_v25  ;;  %v1658_v35 = vmul.f32 %v1654_v39, %v2402_v26  ;;  %v1659_v41 = vmul.f32 %v1650_v2, %v2393_v21  ;;  %v1660_v3 = vmul.f32 %v1654_v39, %v2396_v22  ;;  %v3064_v25 = vld [vmem:[#allocation17_spill] sm:$0xff]  ;;  %v3065_v26 = vld [vmem:[#allocation18_spill] sm:$0xff]  ;;  %v3066_v21 = vld [vmem:[#allocation19_spill] sm:$0xff] }
 0x576   : > { %v1661_v29 = vmul.f32 %v1650_v2, %v3063_v61  ;;  %v1662_v62 = vmul.f32 %v1654_v39, %v3064_v25  ;;  %v1663_v33 = vmul.f32 %v1650_v2, %v3065_v26  ;;  %v1664_v28 = vmul.f32 %v1654_v39, %v3066_v21 }
 0x577   : > { %1665 = vst [vmem:[%s256_s16] sm:$0xff] %v1657_v56  ;;  %1666 = vst [vmem:[%s256_s16 + $0x8] sm:$0xff] %v1658_v35 }
 0x578   : > { %1667 = vst [vmem:[%s256_s16 + $0x10] sm:$0xff] %v1659_v41  ;;  %1668 = vst [vmem:[%s256_s16 + $0x18] sm:$0xff] %v1660_v3 }
 0x579   : > { %1669 = vst [vmem:[%s256_s16 + $0x20] sm:$0xff] %v1661_v29  ;;  %1670 = vst [vmem:[%s256_s16 + $0x28] sm:$0xff] %v1662_v62 }
 0x57a   : > { %1671 = vst [vmem:[%s256_s16 + $0x30] sm:$0xff] %v1663_v33  ;;  %1672 = vst [vmem:[%s256_s16 + $0x38] sm:$0xff] %v1664_v28 }
 0x57b   : > { %2071 = shalt.err (!%p2068_p11)
}
 0x57c   : > { %s2072_s25 = scalar_lea.hbm %s2965_s22, 1024  ;;  %s2076_s0 = scalar_lea.hbm %s3020_s5, 2048 }
 0x57d   : > { %p2073_p0 = scmp.ne.s32.totalorder %s2965_s22, %s2072_s25  ;;  %p2077_p6 = scmp.lt.u32.totalorder %s2965_s22, %s3020_s5 }
 0x57e   : > { %p2078_p3 = scmp.lt.u32.totalorder %s2076_s0, %s2072_s25  ;;  %p2080_p5 = scmp.lt.u32.totalorder %s2072_s25, %s2965_s22 }
 0x57f   : > { %p2074_p2 = pnand %p2073_p0, %p3067_p12 }
 0x580   : > { %p2079_p13 = por %p2078_p3, %p2077_p6 }
 0x581   : > { %p2075_p7 = pneg %p2074_p2 }
 0x582   : > { %p2081_p8 = por %p2080_p5, %p2079_p13 }
 0x584   : > { %p2082_p9 = pnand %p2081_p8, %p2075_p7 }
 0x586   : > { %2085 = shalt.err (!%p2082_p9)
}
 0x587   : > { %s2152_s20 = smov 256   ;;  %s2153_s28 = smov 16  }
 0x588   : > { %1933 = dma.vmem_to_hbm [thread:$0]  (%p3067_p12), %s2967_s23, 1024, %s2965_s22, %s1674_s10, %s2152_s20, %s2152_s20, %s2153_s28  }
 0x589 PF: > { %s1702_s15 = sand.u32 1, %s2116_s18   ;;  %p3068_p10 = scmp.ne.s32.totalorder %s3044_s6, 0 }
 0x58a   : > { %p3069_p1 = scmp.ge.s32.totalorder %s2128_s21, 2  ;;  %s1703_s27 = scalar_lea.sflag [#allocation7], %s1702_s15 }
 0x58c   : > { %p1944_p4 = pnand %p3069_p1, %p3068_p10 }
 0x58e   : > { %2111 = dma.done.wait (!%p1944_p4), %s1703_s27, 1024  }
 0x58f   : > { %2113 = vsyncadd (!%p1944_p4), %s1703_s27, 4294966272  ;;  %s3070_s12 = sld [smem:[#allocation14_spill]]  ;;  %s3071_s20 = sld [smem:[#allocation15_spill]] }
 0x590   : > { %p19_p11 = scmp.ge.s32.totalorder %s2209_s24, 4   ;;  %s3072_s18 = smov %s2120_s19 }
 0x591   : > { %s3074_s21 = smov %s2209_s24 }
 0x592   :  { %21 = sbr.rel (!%p19_p11) target bundleno = 11 (0xb), region = 96 }
 0x595   : > { %s3073_s19 = smov %s3070_s12 }
 0x599   :  { %1708 = vsyncpa [#allocation6], 1 }
 0x59a   :  { %1710 = vsyncpa [#allocation6 + $0x1], 1 }
 0x59b   :  { %1711 = vsyncpa [#allocation7], 1 }
 0x59c   :  { %1713 = vsyncpa [#allocation7 + $0x1], 1 }
 0x59d   :  { %1714 = vsyncpa [#allocation8], 1 }
 0x59e   :  { %1716 = vsyncpa [#allocation8 + $0x1], 1 }

</bundles_post_ra>
